<compile_context>
chip_gen: v7x
topology: tpu7x:2x2x1
jax: 0.10.0
libtpu: 0.0.40
codegen_flags: <defaults>
</compile_context>

<pallas_src>
import numpy as np
import jax
import jax.numpy as jnp
from jax.experimental import pallas as pl
from jax.experimental.pallas import tpu as pltpu

TN_MAX = 512    # triplet rows per tile (sublane-aligned, amortizes per-step overhead)
N_CORES = 2     # leading 'parallel' grid axis: both TCs on v7x, serial loop elsewhere


def _round_up(x, m):
    return ((int(x) + m - 1) // m) * m


def _make_kernel(num_valid, tn, tiles_per_core):
    """Build the kernel for one (tn, 3) tile of triplet indices."""

    def kernel(idx_ref, emb_ref, acc_ref):
        c = pl.program_id(0)          # core (parallel axis)
        i = pl.program_id(1)          # tile within this core (reduction axis)

        @pl.when(i == 0)
        def _init():
            acc_ref[...] = jnp.zeros_like(acc_ref)

        emb = emb_ref[...]            # (E, D) f32, VMEM-resident (constant index_map)
        idx = idx_ref[...]            # (tn, 3) int32
        e_rows = emb.shape[0]

        # One-hot selection matrices (VPU); the row gather itself is two small
        # MXU matmuls (tn, E) @ (E, D).
        col = jax.lax.broadcasted_iota(jnp.int32, (tn, e_rows), 1)
        oh_a = (idx[:, 0:1] == col).astype(jnp.float32)
        oh_p = (idx[:, 1:2] == col).astype(jnp.float32)
        oh_n = (idx[:, 2:3] == col).astype(jnp.float32)

        d_ap = jnp.dot(oh_a - oh_p, emb, preferred_element_type=jnp.float32)  # (tn, D)
        d_an = jnp.dot(oh_a - oh_n, emb, preferred_element_type=jnp.float32)  # (tn, D)

        ap = jnp.sum(d_ap * d_ap, axis=1, keepdims=True)   # (tn, 1)
        an = jnp.sum(d_an * d_an, axis=1, keepdims=True)   # (tn, 1)
        # an == 0 -> inf, matching the unguarded PyTorch reference; padded rows
        # never hit this (they duplicate a valid triplet and are masked anyway).
        losses = ap + pl.reciprocal(an, approx=False)      # (tn, 1)

        start = (c * tiles_per_core + i) * tn

        # Fully-valid tiles skip the padding mask entirely.
        @pl.when(start + tn <= num_valid)
        def _acc_full():
            acc_ref[...] += losses

        # Only trailing tiles (possibly entirely padding) pay for iota/where.
        @pl.when(start + tn > num_valid)
        def _acc_masked():
            row = start + jax.lax.broadcasted_iota(jnp.int32, (tn, 1), 0)
            acc_ref[...] += jnp.where(row < num_valid, losses, 0.0)

    return kernel


def _pallas_recip_triplet_loss(embeddings, triplet_idx):
    """mean_t( ||e[a_t]-e[p_t]||^2 + 1/||e[a_t]-e[n_t]||^2 ) with a Pallas kernel."""
    embeddings = jnp.asarray(embeddings, jnp.float32)
    e_rows, d = embeddings.shape
    triplet_idx = np.asarray(triplet_idx, dtype=np.int32).reshape(-1, 3)
    num_valid = int(triplet_idx.shape[0])
    assert num_valid > 0

    # Row tile: as large as possible, but no bigger than one core's share,
    # rounded up to the 8-sublane granule.
    tn = int(min(TN_MAX, _round_up(pl.cdiv(num_valid, N_CORES), 8)))
    tiles_per_core = int(pl.cdiv(num_valid, N_CORES * tn))
    t_pad = N_CORES * tiles_per_core * tn

    # Pad the *index* array host-side (repeat triplet 0); never copy (T, D) data.
    if t_pad != num_valid:
        pad_rows = np.broadcast_to(triplet_idx[:1], (t_pad - num_valid, 3))
        triplet_idx = np.concatenate([triplet_idx, pad_rows], axis=0)
    idx_dev = jnp.asarray(triplet_idx)                     # (t_pad, 3) int32

    kernel = _make_kernel(num_valid, tn, tiles_per_core)

    grid_spec = pltpu.PrefetchScalarGridSpec(
        num_scalar_prefetch=0,
        grid=(N_CORES, tiles_per_core),
        in_specs=[
            # Streamed triplet-index tiles (only T*12 bytes of HBM traffic).
            pl.BlockSpec((tn, 3), lambda c, i: (c * tiles_per_core + i, 0)),
            # Whole embedding table; constant block index -> stays resident.
            pl.BlockSpec((e_rows, d), lambda c, i: (0, 0)),
        ],
        # Per-core, per-row partial sums. Block index is constant along the
        # reduction axis i, so it acts as a VMEM-resident accumulator; the
        # single cross-row reduce happens once, outside the kernel.
        out_specs=pl.BlockSpec((tn, 1), lambda c, i: (c, 0)),
    )

    partial = pl.pallas_call(
        kernel,
        out_shape=jax.ShapeDtypeStruct((N_CORES * tn, 1), jnp.float32),
        grid_spec=grid_spec,
        compiler_params=pltpu.CompilerParams(
            dimension_semantics=("parallel", "arbitrary"),
            vmem_limit_bytes=48 << 20,   # safe on v7x (64 MiB/TC), generous on v5e/v6e
        ),
    )(idx_dev, embeddings)

    return jnp.sum(partial) / np.float32(num_valid)


def batch_all_triplet_selector(labels):
    """Deterministic host-side selector: all valid (anchor, pos, neg) index triplets."""
    labels = np.asarray(labels)
    triplets = []
    for a in range(len(labels)):
        for p in range(len(labels)):
            if p == a or labels[p] != labels[a]:
                continue
            for n in range(len(labels)):
                if labels[n] == labels[a]:
                    continue
                triplets.append((a, p, n))
    triplets = np.array(triplets, dtype=np.int64).reshape(-1, 3)
    return triplets, triplets.shape[0]


def online_reciprocal_triplet_loss(anchor_embed, pos_embed, neg_embed, labels,
                                   triplet_selector=batch_all_triplet_selector):
    """Mirrors OnlineReciprocalTripletLoss.forward."""
    embeddings = jnp.concatenate((anchor_embed, pos_embed, neg_embed), axis=0)
    triplets, num_triplets = triplet_selector(labels)
    if num_triplets == 0:
        # Fallback: (anchor_i, pos_i, neg_i) rows, expressed as index triplets
        # into the concatenated table -> identical semantics to the reference.
        b = anchor_embed.shape[0]
        ar = np.arange(b, dtype=np.int64)
        triplets = np.stack([ar, b + ar, 2 * b + ar], axis=1)
    return _pallas_recip_triplet_loss(embeddings, triplets)


def _reference_loss(a, p, n):
    ap = jnp.sum((a - p) ** 2, axis=1)
    an = jnp.sum((a - n) ** 2, axis=1)
    return jnp.mean(ap + 1.0 / an)


if __name__ == "__main__":
    key = jax.random.PRNGKey(0)
    B, D = 4, 32
    k1, k2, k3 = jax.random.split(key, 3)
    anchor = jax.random.normal(k1, (B, D), dtype=jnp.float32)
    pos = jax.random.normal(k2, (B, D), dtype=jnp.float32)
    neg = jax.random.normal(k3, (B, D), dtype=jnp.float32)

    # Labels for the concatenated (anchor, pos, neg) embeddings.
    anchor_labels = np.array([0, 0, 1, 1])
    pos_labels = np.array([0, 0, 1, 1])
    neg_labels = np.array([1, 1, 0, 0])
    labels = np.concatenate([anchor_labels, pos_labels, neg_labels])

    # Path with triplets (selector finds > 0 triplets).
    loss = online_reciprocal_triplet_loss(anchor, pos, neg, labels)
    loss = jax.block_until_ready(loss)

    embeddings = jnp.concatenate((anchor, pos, neg), axis=0)
    tri, _ = batch_all_triplet_selector(labels)
    ref = _reference_loss(embeddings[tri[:, 0]], embeddings[tri[:, 1]], embeddings[tri[:, 2]])
    # Tolerance leaves headroom for the MXU's multi-pass f32 handling of the
    # in-kernel one-hot gather matmul (in practice the match is ~1e-6).
    np.testing.assert_allclose(np.asarray(loss), np.asarray(ref), rtol=5e-3, atol=5e-3)

    # Fallback path (num_triplets == 0).
    loss0 = online_reciprocal_triplet_loss(
        anchor, pos, neg, labels,
        triplet_selector=lambda lbl: (np.zeros((0, 3), np.int64), 0))
    loss0 = jax.block_until_ready(loss0)
    ref0 = _reference_loss(anchor, pos, neg)
    np.testing.assert_allclose(np.asarray(loss0), np.asarray(ref0), rtol=5e-3, atol=5e-3)

    print("KERNEL_OK")
</pallas_src>

<mosaic_0001>
module attributes {stable_mosaic.version = 11 : i64} {
  func.func @kernel(%arg0: i32, %arg1: i32, %arg2: memref<184x3xi32, #tpu.memory_space<vmem>>, %arg3: memref<12x32xf32, #tpu.memory_space<vmem>>, %arg4: memref<184x1xf32, #tpu.memory_space<vmem>>) attributes {dimension_semantics = [#tpu.dimension_semantics<parallel>, #tpu.dimension_semantics<arbitrary>], iteration_bounds = array<i64: 2, 1>, scalar_prefetch = 0 : i64, scratch_operands = 0 : i64, tpu.core_type = #tpu.core_type<tc>, window_params = [{transform_indices = @transform_0, window_bounds = array<i64: 184, 3>}, {pipeline_mode = #tpu.pipeline_mode<synchronous>, transform_indices = @transform_1, window_bounds = array<i64: 12, 32>}, {transform_indices = @transform_2, window_bounds = array<i64: 184, 1>}]} {
    %c0_i32 = arith.constant 0 : i32
    %0 = arith.cmpi eq, %arg1, %c0_i32 : i32
    %1 = arith.extui %0 : i1 to i32
    %c0_i32_0 = arith.constant 0 : i32
    %2 = arith.cmpi ne, %1, %c0_i32_0 : i32
    scf.if %2 {
      %cst_12 = arith.constant 0.000000e+00 : f32
      %44 = vector.broadcast %cst_12 : f32 to vector<184x1xf32>
      %c0_13 = arith.constant 0 : index
      %c0_14 = arith.constant 0 : index
      %45 = vector.load %arg4[%c0_13, %c0_14] : memref<184x1xf32, #tpu.memory_space<vmem>>, vector<184x1xf32>
      tpu.vector_store %arg4[%c0_13, %c0_14], %44 {strides = array<i32>} : memref<184x1xf32, #tpu.memory_space<vmem>>, vector<184x1xf32>,
    } else {
    }
    %c0 = arith.constant 0 : index
    %c0_1 = arith.constant 0 : index
    %3 = vector.load %arg3[%c0, %c0_1] : memref<12x32xf32, #tpu.memory_space<vmem>>, vector<12x32xf32>
    %c0_2 = arith.constant 0 : index
    %c0_3 = arith.constant 0 : index
    %4 = vector.load %arg2[%c0_2, %c0_3] : memref<184x3xi32, #tpu.memory_space<vmem>>, vector<184x3xi32>
    %5 = tpu.iota {dimensions = array<i32: 1>} : vector<184x12xi32>
    %6 = vector.extract_strided_slice %4 {offsets = [0, 0], sizes = [184, 1], strides = [1, 1]} : vector<184x3xi32> to vector<184x1xi32>
    %7 = vector.broadcast %6 : vector<184x1xi32> to vector<184x12xi32>
    %8 = arith.cmpi eq, %7, %5 : vector<184x12xi32>
    %9 = arith.extui %8 : vector<184x12xi1> to vector<184x12xi32>
    %10 = arith.sitofp %9 : vector<184x12xi32> to vector<184x12xf32>
    %11 = vector.extract_strided_slice %4 {offsets = [0, 1], sizes = [184, 1], strides = [1, 1]} : vector<184x3xi32> to vector<184x1xi32>
    %12 = vector.broadcast %11 : vector<184x1xi32> to vector<184x12xi32>
    %13 = arith.cmpi eq, %12, %5 : vector<184x12xi32>
    %14 = arith.extui %13 : vector<184x12xi1> to vector<184x12xi32>
    %15 = arith.sitofp %14 : vector<184x12xi32> to vector<184x12xf32>
    %16 = vector.extract_strided_slice %4 {offsets = [0, 2], sizes = [184, 1], strides = [1, 1]} : vector<184x3xi32> to vector<184x1xi32>
    %17 = vector.broadcast %16 : vector<184x1xi32> to vector<184x12xi32>
    %18 = arith.cmpi eq, %17, %5 : vector<184x12xi32>
    %19 = arith.extui %18 : vector<184x12xi1> to vector<184x12xi32>
    %20 = arith.sitofp %19 : vector<184x12xi32> to vector<184x12xf32>
    %21 = arith.subf %10, %15 : vector<184x12xf32>
    %cst = arith.constant dense<0.000000e+00> : vector<184x32xf32>
    %22 = tpu.matmul %21, %3, %cst {dimension_numbers = #tpu.dot_dimension_numbers<[1], [0], [0], [1], [0, 0, 1, 1], [], []>} : vector<184x12xf32>, vector<12x32xf32>, vector<184x32xf32> -> vector<184x32xf32>
    %23 = arith.subf %10, %20 : vector<184x12xf32>
    %cst_4 = arith.constant dense<0.000000e+00> : vector<184x32xf32>
    %24 = tpu.matmul %23, %3, %cst_4 {dimension_numbers = #tpu.dot_dimension_numbers<[1], [0], [0], [1], [0, 0, 1, 1], [], []>} : vector<184x12xf32>, vector<12x32xf32>, vector<184x32xf32> -> vector<184x32xf32>
    %25 = arith.mulf %22, %22 : vector<184x32xf32>
    %cst_5 = arith.constant dense<0.000000e+00> : vector<184xf32>
    %26 = vector.multi_reduction <add>, %25, %cst_5 [1] : vector<184x32xf32> to vector<184xf32>
    %27 = vector.shape_cast %26 : vector<184xf32> to vector<184x1xf32>
    %28 = arith.mulf %24, %24 : vector<184x32xf32>
    %cst_6 = arith.constant dense<0.000000e+00> : vector<184xf32>
    %29 = vector.multi_reduction <add>, %28, %cst_6 [1] : vector<184x32xf32> to vector<184xf32>
    %30 = vector.shape_cast %29 : vector<184xf32> to vector<184x1xf32>
    %31 = tpu.reciprocal %30 : vector<184x1xf32> -> vector<184x1xf32>
    %32 = arith.addf %27, %31 : vector<184x1xf32>
    %c1_i32 = arith.constant 1 : i32
    %33 = arith.muli %arg0, %c1_i32 : i32
    %34 = arith.addi %33, %arg1 : i32
    %c184_i32 = arith.constant 184 : i32
    %35 = arith.muli %34, %c184_i32 : i32
    %c184_i32_7 = arith.constant 184 : i32
    %36 = arith.addi %35, %c184_i32_7 : i32
    %c360_i32 = arith.constant 360 : i32
    %37 = arith.cmpi sle, %36, %c360_i32 : i32
    %38 = arith.extui %37 : i1 to i32
    %c0_i32_8 = arith.constant 0 : i32
    %39 = arith.cmpi ne, %38, %c0_i32_8 : i32
    scf.if %39 {
      %c0_12 = arith.constant 0 : index
      %c0_13 = arith.constant 0 : index
      %44 = vector.load %arg4[%c0_12, %c0_13] : memref<184x1xf32, #tpu.memory_space<vmem>>, vector<184x1xf32>
      %45 = arith.addf %44, %32 : vector<184x1xf32>
      %c0_14 = arith.constant 0 : index
      %c0_15 = arith.constant 0 : index
      %46 = vector.load %arg4[%c0_14, %c0_15] : memref<184x1xf32, #tpu.memory_space<vmem>>, vector<184x1xf32>
      tpu.vector_store %arg4[%c0_14, %c0_15], %45 {strides = array<i32>} : memref<184x1xf32, #tpu.memory_space<vmem>>, vector<184x1xf32>,
    } else {
    }
    %c184_i32_9 = arith.constant 184 : i32
    %40 = arith.addi %35, %c184_i32_9 : i32
    %c360_i32_10 = arith.constant 360 : i32
    %41 = arith.cmpi sgt, %40, %c360_i32_10 : i32
    %42 = arith.extui %41 : i1 to i32
    %c0_i32_11 = arith.constant 0 : i32
    %43 = arith.cmpi ne, %42, %c0_i32_11 : i32
    scf.if %43 {
      %44 = tpu.iota {dimensions = array<i32: 0>} : vector<184x1xi32>
      %45 = vector.broadcast %35 : i32 to vector<184x1xi32>
      %46 = arith.addi %45, %44 : vector<184x1xi32>
      %c0_12 = arith.constant 0 : index
      %c0_13 = arith.constant 0 : index
      %47 = vector.load %arg4[%c0_12, %c0_13] : memref<184x1xf32, #tpu.memory_space<vmem>>, vector<184x1xf32>
      %c360_i32_14 = arith.constant 360 : i32
      %48 = vector.broadcast %c360_i32_14 : i32 to vector<184x1xi32>
      %49 = arith.cmpi slt, %46, %48 : vector<184x1xi32>
      %cst_15 = arith.constant 0.000000e+00 : f32
      %50 = vector.broadcast %cst_15 : f32 to vector<184x1xf32>
      %51 = arith.select %49, %32, %50 : vector<184x1xi1>, vector<184x1xf32>
      %52 = arith.addf %47, %51 : vector<184x1xf32>
      %c0_16 = arith.constant 0 : index
      %c0_17 = arith.constant 0 : index
      %53 = vector.load %arg4[%c0_16, %c0_17] : memref<184x1xf32, #tpu.memory_space<vmem>>, vector<184x1xf32>
      tpu.vector_store %arg4[%c0_16, %c0_17], %52 {strides = array<i32>} : memref<184x1xf32, #tpu.memory_space<vmem>>, vector<184x1xf32>,
    } else {
    }
    return
  }
  func.func @transform_0(%arg0: i32, %arg1: i32) -> (i32, i32) {
    %c1_i32 = arith.constant 1 : i32
    %0 = arith.muli %arg0, %c1_i32 : i32
    %1 = arith.addi %0, %arg1 : i32
    %c0_i32 = arith.constant 0 : i32
    %c0_i32_0 = arith.constant 0 : i32
    return %1, %c0_i32 : i32, i32
  }
  func.func @transform_1(%arg0: i32, %arg1: i32) -> (i32, i32) {
    %c0_i32 = arith.constant 0 : i32
    %c0_i32_0 = arith.constant 0 : i32
    %c0_i32_1 = arith.constant 0 : i32
    return %c0_i32, %c0_i32_0 : i32, i32
  }
  func.func @transform_2(%arg0: i32, %arg1: i32) -> (i32, i32) {
    %c0_i32 = arith.constant 0 : i32
    %c0_i32_0 = arith.constant 0 : i32
    return %arg0, %c0_i32 : i32, i32
  }
}

</mosaic_0001>

<bundles_post_ra>
// kernel: tpu_custom_call.1
= control target key start
LH: loop header
LB: loop body
LE: loop exit
PB: predicated region body
PF: predicated region fallthrough
CT: control target
= control target key end

     0   :  { %s2229_s9 = smov 0   ;;  %s2231_s10 = smov 0   ;;  %s3085_s0 = inlined_call_operand.vmem [shape: s32[368,3], index: 0, kind: input, shape index: {}]   ;;  %s3086_s1 = inlined_call_operand.vmem [shape: f32[12,32], index: 1, kind: input, shape index: {}]   ;;  %s3087_s2 = inlined_call_operand.vmem [shape: f32[368,1], index: 2, kind: output, shape index: {}]  }
   0x1   :  { %s2233_s11 = smov 0  }
   0x2 LB: > { %s24_s12 = sadd.s32 1, %s2201_s10  ;;  %p1729_p0 = scmp.ge.s32.totalorder %s2205_s11, 1  ;;  %s2205_s11 = sphi %s2233_s11, %s12_s11   ;;  %s2201_s10 = sphi %s2231_s10, %s3089_s10   ;;  %s2197_s9 = sphi %s2229_s9, %s3088_s9  }
   0x3   : > { %p26_p1 = scmp.ge.s32.totalorder %s24_s12, 2  ;;  %p129_p2 = scmp.lt.s32.totalorder %s2205_s11, 3 }
   0x5   : > { %s3091_s12 = smov (%p26_p1, %s24_s12), 0  ;;  %p130_p3 = pnand %p1729_p0, %p129_p2 }
   0x6   : > { %s153_s13 = smul.u32 (!%p130_p3), 23, %s2197_s9  ;;  %v2207_v0 = vmov (!%p130_p3), 2   ;;  %v2208_v1 = vmov (!%p130_p3), 0   ;;  %vm170_vm0 = vcmask (!%p130_p3), 7168   ;;  %v2209_v2 = vmov (!%p130_p3), 0.0   ;;  %v194_v6 = vld [vmem:[%s3086_s1] sm:$0xff] (!%p130_p3) }
   0x7   : > { %133 = sbr.rel (%p130_p3) target bundleno = 751 (0x2ef), region = 28  ;;  %2088 = vset.pattern.permute.xlu0 (!%p130_p3), %v2207_v0  ;;  %2089 = vset.pattern.permute.xlu1 (!%p130_p3), %v2208_v1  ;;  %v195_v7 = vld [vmem:[%s3086_s1 + $0x8] sm:$0xf] (!%p130_p3)  ;;  %vm728_vm1 = vcmask (!%p130_p3), 1043456   ;;  %vm2210_vm2 = vmmov (!%p130_p3), 1   ;;  %v2211_v10 = vmov (!%p130_p3), 0.0|0.0   ;;  %v219_v30 = vlaneseq (!%p130_p3) }
   0x8   : > { %p154_p4 = scmp.lt.s32.totalorder (!%p130_p3), %s153_s13, 45  ;;  %v2050_v8 = vpack.c.bf16 (!%p130_p3), %v195_v7, %v194_v6  ;;  %vm2051_vm3 = vmpackc.low (!%p130_p3), %vm728_vm1, %vm2210_vm2  ;;  %2053 = vmatprep.subr.bf16.mxu1 (!%p130_p3), %v2211_v10  ;;  %2049 = vmatprep.subr.bf16.mxu0 (!%p130_p3), %v2211_v10  ;;  %vm2212_vm4 = vmmov (!%p130_p3), 0   ;;  %v2213_v11 = vmov (!%p130_p3), 1   ;;  %vm658_vm8 = vcmask (!%p130_p3), 97280   ;;  %s1416_s25 = smul.u32 (!%p130_p3), 184, %s2197_s9 }
   0x9   : > { %1980 = vmatprep.mubr.msk.f32.mxu1 (!%p130_p3), %vm2212_vm4, %v2209_v2  ;;  %1907 = vmatprep.mubr.msk.f32.mxu0 (!%p130_p3), %vm2212_vm4, %v2209_v2  ;;  %v2419_v33 = vand.u32 (!%p130_p3), 127, %v219_v30 }
   0xa   : > { %2056 = vmatpush3.bf16.msk.msra.mxu1 (!%p130_p3), %vm2051_vm3, %v2050_v8  ;;  %2052 = vmatpush3.bf16.msk.msra.mxu0 (!%p130_p3), %vm2051_vm3, %v2050_v8  ;;  %s2805_s26 = sadd.s32 (!%p130_p3), 184, %s1416_s25 }
   0xb   : > { %p1849_p5 = scmp.gt.s32.totalorder (!%p130_p3), %s2805_s26, 360 }
   0xe   : > { %s3093_s13 = smov (!%p154_p4, %s153_s13), 45 }
   0xf   : > { %s1730_s14 = sshll.u32 %s3093_s13, 3 }
  0x10   : > { %s2255_s17 = scalar_lea.vmem %s3085_s0, %s1730_s14  ;;  %s2260_s20 = scalar_lea.vmem %s3087_s2, %s1730_s14 }
  0x11   : > { %171 = vst.msk [vmem:[%s2260_s20] sm:$0xff] %vm170_vm0, %v2209_v2  ;;  %172 = vst.msk [vmem:[%s2260_s20 + $0x8] sm:$0xff] %vm170_vm0, %v2209_v2  ;;  %v197_v3 = vld [vmem:[%s2255_s17 + $0x8] sm:$0xff]  ;;  %v196_v4 = vld [vmem:[%s2255_s17] sm:$0xff] }
  0x12   : > { %173 = vst.msk [vmem:[%s2260_s20 + $0x10] sm:$0xff] %vm170_vm0, %v2209_v2  ;;  %174 = vst.msk [vmem:[%s2260_s20 + $0x18] sm:$0xff] %vm170_vm0, %v2209_v2  ;;  %225 = vperm.xlu1 %2089, %v197_v3   ;;  %498 = vperm.xlu0 %2088, %v196_v4   ;;  %v198_v5 = vld [vmem:[%s2255_s17 + $0x10] sm:$0xff]  ;;  %v199_v9 = vld [vmem:[%s2255_s17 + $0x18] sm:$0xff] }
  0x13   : > { %175 = vst.msk [vmem:[%s2260_s20 + $0x20] sm:$0xff] %vm170_vm0, %v2209_v2  ;;  %176 = vst.msk [vmem:[%s2260_s20 + $0x28] sm:$0xff] %vm170_vm0, %v2209_v2  ;;  %v200_v12 = vld [vmem:[%s2255_s17 + $0x20] sm:$0xff]  ;;  %v205_v14 = vld [vmem:[%s2255_s17 + $0x48] sm:$0xff] }
  0x14   : > { %177 = vst.msk [vmem:[%s2260_s20 + $0x30] sm:$0xff] %vm170_vm0, %v2209_v2  ;;  %178 = vst.msk [vmem:[%s2260_s20 + $0x38] sm:$0xff] %vm170_vm0, %v2209_v2  ;;  %v204_v13 = vld [vmem:[%s2255_s17 + $0x40] sm:$0xff]  ;;  %v201_v15 = vld [vmem:[%s2255_s17 + $0x28] sm:$0xff] }
  0x15   : > { %179 = vst.msk [vmem:[%s2260_s20 + $0x40] sm:$0xff] %vm170_vm0, %v2209_v2  ;;  %180 = vst.msk [vmem:[%s2260_s20 + $0x48] sm:$0xff] %vm170_vm0, %v2209_v2  ;;  %v203_v16 = vld [vmem:[%s2255_s17 + $0x38] sm:$0xff]  ;;  %v202_v17 = vld [vmem:[%s2255_s17 + $0x30] sm:$0xff] }
  0x16   : > { %181 = vst.msk [vmem:[%s2260_s20 + $0x50] sm:$0xff] %vm170_vm0, %v2209_v2  ;;  %182 = vst.msk [vmem:[%s2260_s20 + $0x58] sm:$0xff] %vm170_vm0, %v2209_v2  ;;  %2090 = vset.pattern.permute.xlu1 %v2207_v0  ;;  %504 = vperm.xlu0 %2088, %v198_v5   ;;  %v208_v18 = vld [vmem:[%s2255_s17 + $0x60] sm:$0xff]  ;;  %v209_v19 = vld [vmem:[%s2255_s17 + $0x68] sm:$0xff] }
  0x17   : > { %183 = vst.msk [vmem:[%s2260_s20 + $0x60] sm:$0xff] %vm170_vm0, %v2209_v2  ;;  %184 = vst.msk [vmem:[%s2260_s20 + $0x68] sm:$0xff] %vm170_vm0, %v2209_v2  ;;  %501 = vperm.xlu1 %2090, %v197_v3   ;;  %v207_v20 = vld [vmem:[%s2255_s17 + $0x58] sm:$0xff]  ;;  %v2371_v21 = vld [vmem:[%s2255_s17 + $0x80] sm:$0xff] }
  0x18   : > { %185 = vst.msk [vmem:[%s2260_s20 + $0x70] sm:$0xff] %vm170_vm0, %v2209_v2  ;;  %186 = vst.msk [vmem:[%s2260_s20 + $0x78] sm:$0xff] %vm170_vm0, %v2209_v2  ;;  %v2376_v22 = vld [vmem:[%s2255_s17 + $0x88] sm:$0xff]  ;;  %v206_v23 = vld [vmem:[%s2255_s17 + $0x50] sm:$0xff] }
  0x19   : > { %187 = vst.msk [vmem:[%s2260_s20 + $0x80] sm:$0xff] %vm170_vm0, %v2209_v2  ;;  %188 = vst.msk [vmem:[%s2260_s20 + $0x88] sm:$0xff] %vm170_vm0, %v2209_v2  ;;  %v210_v24 = vld [vmem:[%s2255_s17 + $0x70] sm:$0xff]  ;;  %v2391_v26 = vld [vmem:[%s2255_s17 + $0x98] sm:$0xff] }
  0x1a   : > { %189 = vst.msk [vmem:[%s2260_s20 + $0x90] sm:$0xff] %vm170_vm0, %v2209_v2  ;;  %190 = vst.msk [vmem:[%s2260_s20 + $0x98] sm:$0xff] %vm170_vm0, %v2209_v2  ;;  %2092 = vset.pattern.permute.xlu0 %v2208_v1  ;;  %v2386_v25 = vld [vmem:[%s2255_s17 + $0x90] sm:$0xff]  ;;  %v2400_v27 = vld [vmem:[%s2255_s17 + $0xa8] sm:$0xff] }
  0x1b   : > { %191 = vst.msk [vmem:[%s2260_s20 + $0xa0] sm:$0xff] %vm170_vm0, %v2209_v2  ;;  %192 = vst.msk [vmem:[%s2260_s20 + $0xa8] sm:$0xff] %vm170_vm0, %v2209_v2  ;;  %2091 = vset.pattern.permute.xlu1 %v2208_v1  ;;  %222 = vperm.xlu0 %2092, %v196_v4   ;;  %v2406_v28 = vld [vmem:[%s2255_s17 + $0xb0] sm:$0xff]  ;;  %v211_v29 = vld [vmem:[%s2255_s17 + $0x78] sm:$0xff] }
  0x1c   : > { %193 = vst.msk [vmem:[%s2260_s20 + $0xb0] sm:$0xff] %vm170_vm0, %v2209_v2  ;;  %228 = vperm.xlu1 %2091, %v198_v5  }
  0x1f   : > { %231 = vperm.xlu0 %2092, %v199_v9  }
  0x20   : > { %2093 = vset.pattern.permute.xlu1 %v2213_v11 }
  0x21   : > { %360 = vperm.xlu1 %2093, %v196_v4  }
  0x23   : > { %234 = vperm.xlu0 %2092, %v200_v12  }
  0x25   : > { %2094 = vset.pattern.permute.xlu1 %v2207_v0 }
  0x26   : > { %507 = vperm.xlu1 %2094, %v199_v9  }
  0x27   : > { %246 = vperm.xlu0 %2092, %v204_v13  }
  0x2a   : > { %2095 = vset.pattern.permute.xlu1 %v2213_v11 }
  0x2b   : > { %363 = vperm.xlu1 %2095, %v197_v3   ;;  %249 = vperm.xlu0 %2092, %v205_v14  }
  0x2f   : > { %2096 = vset.pattern.permute.xlu1 %v2207_v0  ;;  %2105 = vset.pattern.permute.xlu0 %v2213_v11 }
  0x30   : > { %510 = vperm.xlu1 %2096, %v200_v12   ;;  %366 = vperm.xlu0 %2105, %v198_v5  }
  0x34   : > { %2097 = vset.pattern.permute.xlu1 %v2208_v1  ;;  %369 = vperm.xlu0 %2105, %v199_v9  }
  0x35   : > { %237 = vperm.xlu1 %2097, %v201_v15  }
  0x38   : > { %381 = vperm.xlu0 %2105, %v203_v16  }
  0x39   : > { %2098 = vset.pattern.permute.xlu1 %v2207_v0 }
  0x3a   : > { %513 = vperm.xlu1 %2098, %v201_v15  }
  0x3c   : > { %384 = vperm.xlu0 %2105, %v204_v13  }
  0x3e   : > { %2099 = vset.pattern.permute.xlu1 %v2208_v1 }
  0x3f   : > { %240 = vperm.xlu1 %2099, %v202_v17  }
  0x40   : > { %396 = vperm.xlu0 %2105, %v208_v18  }
  0x43   : > { %2100 = vset.pattern.permute.xlu1 %v2213_v11 }
  0x44   : > { %372 = vperm.xlu1 %2100, %v200_v12   ;;  %399 = vperm.xlu0 %2105, %v209_v19  }
  0x48   : > { %2101 = vset.pattern.permute.xlu1 %v2208_v1  ;;  %2118 = vset.pattern.permute.xlu0 %v2207_v0 }
  0x49   : > { %243 = vperm.xlu1 %2101, %v203_v16   ;;  %516 = vperm.xlu0 %2118, %v202_v17  }
  0x4d   : > { %2102 = vset.pattern.permute.xlu1 %v2213_v11  ;;  %519 = vperm.xlu0 %2118, %v203_v16  }
  0x4e   : > { %375 = vperm.xlu1 %2102, %v201_v15  }
  0x51   : > { %531 = vperm.xlu0 %2118, %v207_v20  }
  0x52   : > { %2103 = vset.pattern.permute.xlu1 %v2207_v0 }
  0x53   : > { %522 = vperm.xlu1 %2103, %v204_v13  }
  0x55   : > { %534 = vperm.xlu0 %2118, %v208_v18  }
  0x57   : > { %2104 = vset.pattern.permute.xlu1 %v2213_v11 }
  0x58   : > { %378 = vperm.xlu1 %2104, %v202_v17  }
  0x59   : > { %546 = vperm.xlu0 %2118, %v2371_v21  }
  0x5c   : > { %2106 = vset.pattern.permute.xlu1 %v2207_v0 }
  0x5d   : > { %525 = vperm.xlu1 %2106, %v205_v14   ;;  %549 = vperm.xlu0 %2118, %v2376_v22  }
  0x61   : > { %2107 = vset.pattern.permute.xlu1 %v2208_v1  ;;  %2122 = vset.pattern.permute.xlu0 %v2208_v1 }
  0x62   : > { %252 = vperm.xlu1 %2107, %v206_v23   ;;  %261 = vperm.xlu0 %2122, %v209_v19  }
  0x66   : > { %2108 = vset.pattern.permute.xlu1 %v2207_v0  ;;  %264 = vperm.xlu0 %2122, %v210_v24  }
  0x67   : > { %528 = vperm.xlu1 %2108, %v206_v23  }
  0x6a   : > { %276 = vperm.xlu0 %2122, %v2386_v25  }
  0x6b   : > { %2109 = vset.pattern.permute.xlu1 %v2208_v1 }
  0x6c   : > { %255 = vperm.xlu1 %2109, %v207_v20  }
  0x6e   : > { %279 = vperm.xlu0 %2122, %v2391_v26  }
  0x70   : > { %2110 = vset.pattern.permute.xlu1 %v2213_v11 }
  0x71   : > { %387 = vperm.xlu1 %2110, %v205_v14   ;;  %v216_v14 = vld [vmem:[%s2255_s17 + $0xa0] sm:$0xff] }
  0x72   : > { %2127 = vset.pattern.permute.xlu0 %v2213_v11 }
  0x73   : > { %411 = vperm.xlu0 %2127, %v2376_v22  }
  0x75   : > { %2111 = vset.pattern.permute.xlu1 %v2208_v1 }
  0x76   : > { %258 = vperm.xlu1 %2111, %v208_v18  }
  0x77   : > { %414 = vperm.xlu0 %2127, %v2386_v25  }
  0x7a   : > { %2112 = vset.pattern.permute.xlu1 %v2213_v11 }
  0x7b   : > { %390 = vperm.xlu1 %2112, %v206_v23   ;;  %2131 = vset.pattern.permute.xlu0 %v2207_v0 }
  0x7c   : > { %561 = vperm.xlu0 %2131, %v2400_v27  }
  0x7f   : > { %2113 = vset.pattern.permute.xlu1 %v2207_v0 }
  0x80   : > { %537 = vperm.xlu1 %2113, %v209_v19   ;;  %564 = vperm.xlu0 %2131, %v2406_v28  }
  0x84   : > { %2114 = vset.pattern.permute.xlu1 %v2213_v11  ;;  %2135 = vset.pattern.permute.xlu0 %v2213_v11 }
  0x85   : > { %393 = vperm.xlu1 %2114, %v207_v20   ;;  %423 = vperm.xlu0 %2135, %v2400_v27  }
  0x89   : > { %2115 = vset.pattern.permute.xlu1 %v2207_v0  ;;  %2136 = vset.pattern.permute.xlu0 %v2207_v0 }
  0x8a   : > { %540 = vperm.xlu1 %2115, %v210_v24  }
  0x8e   : > { %2116 = vset.pattern.permute.xlu1 %v2208_v1 }
  0x8f   : > { %267 = vperm.xlu1 %2116, %v211_v29  }
  0x91   : > { %v226_v31 = vpop.permute.xlu1 %225  ;;  %v499_v32 = vpop.permute.xlu0 %498 }
  0x92   : > { %vm566_vm5 = vcmp.eq.s32.totalorder %v499_v32, %v2419_v33  ;;  %vm291_vm9 = vcmp.eq.s32.totalorder %v226_v31, %v2419_v33 }
  0x93   : > { %2117 = vset.pattern.permute.xlu1 %v2207_v0  ;;  %v1778_v36 = vsel %vm566_vm5, 1.0, %v2209_v2  ;;  %v1733_v43 = vsel %vm291_vm9, 1.0, %v2209_v2 }
  0x94   : > { %543 = vperm.xlu1 %2117, %v211_v29  }
  0x95   : > { %v505_v34 = vpop.permute.xlu0 %504 }
  0x96   : > { %v502_v35 = vpop.permute.xlu1 %501  ;;  %vm568_vm10 = vcmp.eq.s32.totalorder %v505_v34, %v2419_v33 }
  0x97   : > { %vm567_vm6 = vcmp.eq.s32.totalorder %v502_v35, %v2419_v33  ;;  %v1780_v46 = vsel %vm568_vm10, 1.0, %v2209_v2 }
  0x98   : > { %2119 = vset.pattern.permute.xlu1 %v2208_v1  ;;  %v1779_v41 = vsel %vm567_vm6, 1.0, %v2209_v2 }
  0x99   : > { %270 = vperm.xlu1 %2119, %v2371_v21   ;;  %v913_v45 = vsub.f32 %v1733_v43, %v1779_v41 }
  0x9a   : > { %v223_v37 = vpop.permute.xlu0 %222 }
  0x9b   : > { %vm290_vm7 = vcmp.eq.s32.totalorder %v223_v37, %v2419_v33  ;;  %v229_v38 = vpop.permute.xlu1 %228 }
  0x9c   : > { %v1732_v39 = vsel %vm290_vm7, 1.0, %v2209_v2  ;;  %vm292_vm11 = vcmp.eq.s32.totalorder %v229_v38, %v2419_v33 }
  0x9d   : > { %v912_v40 = vsub.f32 %v1732_v39, %v1778_v36  ;;  %2120 = vset.pattern.permute.xlu1 %v2213_v11  ;;  %v1734_v47 = vsel %vm292_vm11, 1.0, %v2209_v2 }
  0x9e   : > { %402 = vperm.xlu1 %2120, %v210_v24   ;;  %v232_v42 = vpop.permute.xlu0 %231  ;;  %v914_v51 = vsub.f32 %v1734_v47, %v1780_v46 }
  0x9f   : > { %1981 = vmatmul.mubr.msk.f32.vlgmr.msra.gmra.mrb[0].mxu1 %vm658_vm8, %v912_v40  ;;  %vm293_vm13 = vcmp.eq.s32.totalorder %v232_v42, %v2419_v33 }
  0xa0   : > { %v361_v44 = vpop.permute.xlu1 %360  ;;  %1983 = vmatprep.mubr.msk.f32.mxu1 %vm2212_vm4, %v2209_v2  ;;  %v1735_v52 = vsel %vm293_vm13, 1.0, %v2209_v2 }
  0xa1   : > { %vm428_vm12 = vcmp.eq.s32.totalorder %v361_v44, %v2419_v33 }
  0xa2   : > { %v1755_v48 = vsel %vm428_vm12, 1.0, %v2209_v2  ;;  %2121 = vset.pattern.permute.xlu1 %v2208_v1  ;;  %v235_v49 = vpop.permute.xlu0 %234 }
  0xa3   : > { %v635_v50 = vsub.f32 %v1732_v39, %v1755_v48  ;;  %273 = vperm.xlu1 %2121, %v2376_v22   ;;  %1984 = vmatmul.mubr.msk.f32.gmra.mrb[2].mxu1 %vm658_vm8, %v913_v45  ;;  %vm294_vm1 = vcmp.eq.s32.totalorder %v235_v49, %v2419_v33 }
  0xa4   : > { %1986 = vmatprep.mubr.msk.f32.mxu1 %vm2212_vm4, %v2209_v2  ;;  %v1736_v61 = vsel %vm294_vm1, 1.0, %v2209_v2 }
  0xa5   : > { %v508_v53 = vpop.permute.xlu1 %507  ;;  %1908 = vmatmul.mubr.msk.f32.vlgmr.msra.gmra.mrb[0].mxu0 %vm658_vm8, %v635_v50 }
  0xa6   : > { %vm569_vm14 = vcmp.eq.s32.totalorder %v508_v53, %v2419_v33  ;;  %v2450_v54 = vpop.permute.xlu0 %246  ;;  %1910 = vmatprep.mubr.msk.f32.mxu0 %vm2212_vm4, %v2209_v2 }
  0xa7   : > { %v1781_v55 = vsel %vm569_vm14, 1.0, %v2209_v2  ;;  %2123 = vset.pattern.permute.xlu1 %v2213_v11  ;;  %1987 = vmatmul.mubr.msk.f32.gmra.mrb[4].mxu1 %vm658_vm8, %v914_v51 }
  0xa8   : > { %v915_v56 = vsub.f32 %v1735_v52, %v1781_v55  ;;  %405 = vperm.xlu1 %2123, %v211_v29   ;;  %1989 = vmatprep.mubr.msk.f32.mxu1 %vm2212_vm4, %v2209_v2 }
  0xaa   : > { %v364_v57 = vpop.permute.xlu1 %363  ;;  %v2459_v58 = vpop.permute.xlu0 %249 }
  0xab   : > { %vm429_vm15 = vcmp.eq.s32.totalorder %v364_v57, %v2419_v33  ;;  %1990 = vmatmul.mubr.msk.f32.gmra.mrb[6].mxu1 %vm658_vm8, %v915_v56 }
  0xac   : > { %v1756_v59 = vsel %vm429_vm15, 1.0, %v2209_v2  ;;  %2124 = vset.pattern.permute.xlu1 %v2207_v0  ;;  %1992 = vmatprep.mubr.msk.f32.mxu1 %vm2212_vm4, %v2209_v2  ;;  %vm298_vm15 = vcmp.eq.s32.totalorder %v2450_v54, %v2419_v33 }
  0xad   : > { %v636_v60 = vsub.f32 %v1733_v43, %v1756_v59  ;;  %552 = vperm.xlu1 %2124, %v2386_v25   ;;  %v1740_v39 = vsel %vm298_vm15, 1.0, %v2209_v2 }
  0xaf   : > { %v511_v62 = vpop.permute.xlu1 %510  ;;  %1911 = vmatmul.mubr.msk.f32.gmra.mrb[2].mxu0 %vm658_vm8, %v636_v60  ;;  %v367_v63 = vpop.permute.xlu0 %366 }
  0xb0   : > { %vm570_vm2 = vcmp.eq.s32.totalorder %v511_v62, %v2419_v33  ;;  %vm430_vm3 = vcmp.eq.s32.totalorder %v367_v63, %v2419_v33  ;;  %1913 = vmatprep.mubr.msk.f32.mxu0 %vm2212_vm4, %v2209_v2 }
  0xb1   : > { %v1782_v3 = vsel %vm570_vm2, 1.0, %v2209_v2  ;;  %v1757_v4 = vsel %vm430_vm3, 1.0, %v2209_v2  ;;  %2125 = vset.pattern.permute.xlu1 %v2213_v11 }
  0xb2   : > { %v916_v5 = vsub.f32 %v1736_v61, %v1782_v3  ;;  %v637_v6 = vsub.f32 %v1734_v47, %v1757_v4  ;;  %408 = vperm.xlu1 %2125, %v2371_v21  }
  0xb3   : > { %v370_v7 = vpop.permute.xlu0 %369 }
  0xb4   : > { %vm431_vm5 = vcmp.eq.s32.totalorder %v370_v7, %v2419_v33  ;;  %v238_v8 = vpop.permute.xlu1 %237  ;;  %1914 = vmatmul.mubr.msk.f32.gmra.mrb[4].mxu0 %vm658_vm8, %v637_v6  ;;  %1993 = vmatmul.mubr.msk.f32.gmra.mrb[8].mxu1 %vm658_vm8, %v916_v5 }
  0xb5   : > { %v1758_v9 = vsel %vm431_vm5, 1.0, %v2209_v2  ;;  %1916 = vmatprep.mubr.msk.f32.mxu0 %vm2212_vm4, %v2209_v2  ;;  %1995 = vmatprep.mubr.msk.f32.mxu1 %vm2212_vm4, %v2209_v2  ;;  %vm295_vm6 = vcmp.eq.s32.totalorder %v238_v8, %v2419_v33  ;;  %vm299_vm5 = vcmp.eq.s32.totalorder %v2459_v58, %v2419_v33 }
  0xb6   : > { %v638_v10 = vsub.f32 %v1735_v52, %v1758_v9  ;;  %2126 = vset.pattern.permute.xlu1 %v2207_v0  ;;  %v1737_v15 = vsel %vm295_vm6, 1.0, %v2209_v2  ;;  %v1741_v45 = vsel %vm299_vm5, 1.0, %v2209_v2 }
  0xb7   : > { %555 = vperm.xlu1 %2126, %v2391_v26   ;;  %v2489_v12 = vpop.permute.xlu0 %381 }
  0xb8   : > { %1917 = vmatmul.mubr.msk.f32.gmra.mrb[6].mxu0 %vm658_vm8, %v638_v10  ;;  %vm435_vm2 = vcmp.eq.s32.totalorder %v2489_v12, %v2419_v33 }
  0xb9   : > { %v514_v13 = vpop.permute.xlu1 %513  ;;  %1919 = vmatprep.mubr.msk.f32.mxu0 %vm2212_vm4, %v2209_v2  ;;  %v1762_v44 = vsel %vm435_vm2, 1.0, %v2209_v2 }
  0xba   : > { %vm571_vm7 = vcmp.eq.s32.totalorder %v514_v13, %v2419_v33 }
  0xbb   : > { %v1783_v16 = vsel %vm571_vm7, 1.0, %v2209_v2  ;;  %2128 = vset.pattern.permute.xlu1 %v2208_v1  ;;  %v2500_v17 = vpop.permute.xlu0 %384 }
  0xbc   : > { %v917_v18 = vsub.f32 %v1737_v15, %v1783_v16  ;;  %282 = vperm.xlu1 %2128, %v216_v14   ;;  %vm436_vm6 = vcmp.eq.s32.totalorder %v2500_v17, %v2419_v33 }
  0xbd   : > { %v1763_v47 = vsel %vm436_vm6, 1.0, %v2209_v2 }
  0xbe   : > { %v241_v19 = vpop.permute.xlu1 %240  ;;  %1996 = vmatmul.mubr.msk.f32.gmra.mrb[10].mxu1 %vm658_vm8, %v917_v18  ;;  %v643_v50 = vsub.f32 %v1740_v39, %v1763_v47 }
  0xbf   : > { %v2503_v20 = vpop.permute.xlu0 %396  ;;  %1998 = vmatprep.mubr.msk.f32.mxu1 %vm2212_vm4, %v2209_v2  ;;  %vm296_vm10 = vcmp.eq.s32.totalorder %v241_v19, %v2419_v33 }
  0xc0   : > { %2129 = vset.pattern.permute.xlu1 %v2207_v0  ;;  %v1738_v0 = vsel %vm296_vm10, 1.0, %v2209_v2  ;;  %vm440_vm5 = vcmp.eq.s32.totalorder %v2503_v20, %v2419_v33 }
  0xc1   : > { %558 = vperm.xlu1 %2129, %v216_v14  }
  0xc3   : > { %v373_v21 = vpop.permute.xlu1 %372  ;;  %v2508_v22 = vpop.permute.xlu0 %399 }
  0xc4   : > { %vm432_vm9 = vcmp.eq.s32.totalorder %v373_v21, %v2419_v33 }
  0xc5   : > { %v1759_v23 = vsel %vm432_vm9, 1.0, %v2209_v2  ;;  %2130 = vset.pattern.permute.xlu1 %v2208_v1 }
  0xc6   : > { %v639_v24 = vsub.f32 %v1736_v61, %v1759_v23  ;;  %285 = vperm.xlu1 %2130, %v2400_v27  }
  0xc8   : > { %v244_v25 = vpop.permute.xlu1 %243  ;;  %1920 = vmatmul.mubr.msk.f32.gmra.mrb[8].mxu0 %vm658_vm8, %v639_v24  ;;  %v517_v29 = vpop.permute.xlu0 %516 }
  0xc9   : > { %vm572_vm11 = vcmp.eq.s32.totalorder %v517_v29, %v2419_v33  ;;  %1922 = vmatprep.mubr.msk.f32.mxu0 %vm2212_vm4, %v2209_v2  ;;  %vm297_vm12 = vcmp.eq.s32.totalorder %v244_v25, %v2419_v33  ;;  %v1767_v25 = vsel %vm440_vm5, 1.0, %v2209_v2 }
  0xca   : > { %v1784_v31 = vsel %vm572_vm11, 1.0, %v2209_v2  ;;  %2132 = vset.pattern.permute.xlu1 %v2213_v11  ;;  %v1739_v35 = vsel %vm297_vm12, 1.0, %v2209_v2 }
  0xcb   : > { %v918_v27 = vsub.f32 %v1738_v0, %v1784_v31  ;;  %417 = vperm.xlu1 %2132, %v2391_v26   ;;  %v642_v48 = vsub.f32 %v1739_v35, %v1762_v44 }
  0xcc   : > { %v520_v32 = vpop.permute.xlu0 %519 }
  0xcd   : > { %vm573_vm13 = vcmp.eq.s32.totalorder %v520_v32, %v2419_v33  ;;  %v376_v34 = vpop.permute.xlu1 %375  ;;  %1999 = vmatmul.mubr.msk.f32.gmra.mrb[12].mxu1 %vm658_vm8, %v918_v27 }
  0xce   : > { %v1785_v36 = vsel %vm573_vm13, 1.0, %v2209_v2  ;;  %vm433_vm14 = vcmp.eq.s32.totalorder %v376_v34, %v2419_v33  ;;  %2001 = vmatprep.mubr.msk.f32.mxu1 %vm2212_vm4, %v2209_v2 }
  0xcf   : > { %v919_v37 = vsub.f32 %v1739_v35, %v1785_v36  ;;  %v1760_v26 = vsel %vm433_vm14, 1.0, %v2209_v2  ;;  %2133 = vset.pattern.permute.xlu1 %v2208_v1 }
  0xd0   : > { %v640_v38 = vsub.f32 %v1737_v15, %v1760_v26  ;;  %288 = vperm.xlu1 %2133, %v2406_v28   ;;  %v532_v52 = vpop.permute.xlu0 %531 }
  0xd1   : > { %2002 = vmatmul.mubr.msk.f32.gmra.mrb[14].mxu1 %vm658_vm8, %v919_v37  ;;  %vm577_vm11 = vcmp.eq.s32.totalorder %v532_v52, %v2419_v33 }
  0xd2   : > { %v523_v40 = vpop.permute.xlu1 %522  ;;  %1923 = vmatmul.mubr.msk.f32.gmra.mrb[10].mxu0 %vm658_vm8, %v640_v38  ;;  %2004 = vmatprep.mubr.msk.f32.mxu1 %vm2212_vm4, %v2209_v2  ;;  %v1789_v58 = vsel %vm577_vm11, 1.0, %v2209_v2 }
  0xd3   : > { %vm574_vm1 = vcmp.eq.s32.totalorder %v523_v40, %v2419_v33  ;;  %1925 = vmatprep.mubr.msk.f32.mxu0 %vm2212_vm4, %v2209_v2 }
  0xd4   : > { %v1786_v1 = vsel %vm574_vm1, 1.0, %v2209_v2  ;;  %2134 = vset.pattern.permute.xlu1 %v2213_v11  ;;  %v535_v57 = vpop.permute.xlu0 %534 }
  0xd5   : > { %v920_v41 = vsub.f32 %v1740_v39, %v1786_v1  ;;  %420 = vperm.xlu1 %2134, %v216_v14   ;;  %vm578_vm14 = vcmp.eq.s32.totalorder %v535_v57, %v2419_v33 }
  0xd6   : > { %v1790_v5 = vsel %vm578_vm14, 1.0, %v2209_v2 }
  0xd7   : > { %v379_v42 = vpop.permute.xlu1 %378  ;;  %2005 = vmatmul.mubr.msk.f32.gmra.mrb[16].mxu1 %vm658_vm8, %v920_v41 }
  0xd8   : > { %vm434_vm3 = vcmp.eq.s32.totalorder %v379_v42, %v2419_v33  ;;  %2007 = vmatprep.mubr.msk.f32.mxu1 %vm2212_vm4, %v2209_v2  ;;  %v2586_v62 = vpop.permute.xlu0 %546 }
  0xd9   : > { %v1761_v43 = vsel %vm434_vm3, 1.0, %v2209_v2  ;;  %426 = vperm.xlu1 %2134, %v2406_v28  }
  0xda   : > { %v641_v11 = vsub.f32 %v1738_v0, %v1761_v43 }
  0xdc   : > { %v526_v46 = vpop.permute.xlu1 %525  ;;  %1926 = vmatmul.mubr.msk.f32.gmra.mrb[12].mxu0 %vm658_vm8, %v641_v11  ;;  %v2595_v6 = vpop.permute.xlu0 %549 }
  0xdd   : > { %vm575_vm7 = vcmp.eq.s32.totalorder %v526_v46, %v2419_v33  ;;  %1928 = vmatprep.mubr.msk.f32.mxu0 %vm2212_vm4, %v2209_v2 }
  0xde   : > { %v1787_v28 = vsel %vm575_vm7, 1.0, %v2209_v2 }
  0xdf   : > { %v921_v49 = vsub.f32 %v1741_v45, %v1787_v28 }
  0xe0   : > { %1929 = vmatmul.mubr.msk.f32.gmra.mrb[14].mxu0 %vm658_vm8, %v642_v48 }
  0xe1   : > { %v253_v51 = vpop.permute.xlu1 %252  ;;  %2008 = vmatmul.mubr.msk.f32.gmra.mrb[18].mxu1 %vm658_vm8, %v921_v49  ;;  %1931 = vmatprep.mubr.msk.f32.mxu0 %vm2212_vm4, %v2209_v2  ;;  %v262_v12 = vpop.permute.xlu0 %261 }
  0xe2   : > { %2010 = vmatprep.mubr.msk.f32.mxu1 %vm2212_vm4, %v2209_v2  ;;  %vm300_vm9 = vcmp.eq.s32.totalorder %v253_v51, %v2419_v33  ;;  %vm303_vm2 = vcmp.eq.s32.totalorder %v262_v12, %v2419_v33 }
  0xe3   : > { %v1742_v54 = vsel %vm300_vm9, 1.0, %v2209_v2  ;;  %v1745_v16 = vsel %vm303_vm2, 1.0, %v2209_v2  ;;  %vm441_vm9 = vcmp.eq.s32.totalorder %v2508_v22, %v2419_v33 }
  0xe4   : > { %1932 = vmatmul.mubr.msk.f32.gmra.mrb[16].mxu0 %vm658_vm8, %v643_v50  ;;  %v1768_v27 = vsel %vm441_vm9, 1.0, %v2209_v2 }
  0xe5   : > { %1934 = vmatprep.mubr.msk.f32.mxu0 %vm2212_vm4, %v2209_v2  ;;  %v265_v19 = vpop.permute.xlu0 %264  ;;  %v648_v22 = vsub.f32 %v1745_v16, %v1768_v27 }
  0xe6   : > { %v529_v53 = vpop.permute.xlu1 %528  ;;  %vm304_vm7 = vcmp.eq.s32.totalorder %v265_v19, %v2419_v33 }
  0xe7   : > { %vm576_vm10 = vcmp.eq.s32.totalorder %v529_v53, %v2419_v33  ;;  %v1746_v20 = vsel %vm304_vm7, 1.0, %v2209_v2 }
  0xe8   : > { %v1788_v55 = vsel %vm576_vm10, 1.0, %v2209_v2 }
  0xe9   : > { %v922_v56 = vsub.f32 %v1742_v54, %v1788_v55  ;;  %v277_v44 = vpop.permute.xlu0 %276 }
  0xea   : > { %vm308_vm5 = vcmp.eq.s32.totalorder %v277_v44, %v2419_v33 }
  0xeb   : > { %v256_v59 = vpop.permute.xlu1 %255  ;;  %2011 = vmatmul.mubr.msk.f32.gmra.mrb[20].mxu1 %vm658_vm8, %v922_v56  ;;  %v1750_v51 = vsel %vm308_vm5, 1.0, %v2209_v2 }
  0xec   : > { %vm301_vm12 = vcmp.eq.s32.totalorder %v256_v59, %v2419_v33  ;;  %2013 = vmatprep.mubr.msk.f32.mxu1 %vm2212_vm4, %v2209_v2 }
  0xed   : > { %v1743_v60 = vsel %vm301_vm12, 1.0, %v2209_v2  ;;  %v280_v28 = vpop.permute.xlu0 %279 }
  0xee   : > { %v923_v61 = vsub.f32 %v1743_v60, %v1789_v58 }
  0xf0   : > { %v388_v63 = vpop.permute.xlu1 %387  ;;  %2014 = vmatmul.mubr.msk.f32.gmra.mrb[22].mxu1 %vm658_vm8, %v923_v61 }
  0xf1   : > { %vm437_vm13 = vcmp.eq.s32.totalorder %v388_v63, %v2419_v33  ;;  %2016 = vmatprep.mubr.msk.f32.mxu1 %vm2212_vm4, %v2209_v2 }
  0xf2   : > { %v1764_v3 = vsel %vm437_vm13, 1.0, %v2209_v2  ;;  %vm582_vm13 = vcmp.eq.s32.totalorder %v2586_v62, %v2419_v33 }
  0xf3   : > { %v644_v4 = vsub.f32 %v1741_v45, %v1764_v3  ;;  %v1794_v39 = vsel %vm582_vm13, 1.0, %v2209_v2 }
  0xf5   : > { %v259_v7 = vpop.permute.xlu1 %258  ;;  %1935 = vmatmul.mubr.msk.f32.gmra.mrb[18].mxu0 %vm658_vm8, %v644_v4 }
  0xf6   : > { %vm302_vm15 = vcmp.eq.s32.totalorder %v259_v7, %v2419_v33  ;;  %1937 = vmatprep.mubr.msk.f32.mxu0 %vm2212_vm4, %v2209_v2 }
  0xf7   : > { %v1744_v8 = vsel %vm302_vm15, 1.0, %v2209_v2 }
  0xf8   : > { %v924_v9 = vsub.f32 %v1744_v8, %v1790_v5  ;;  %v647_v0 = vsub.f32 %v1744_v8, %v1767_v25 }
  0xfa   : > { %v391_v10 = vpop.permute.xlu1 %390  ;;  %2017 = vmatmul.mubr.msk.f32.gmra.mrb[24].mxu1 %vm658_vm8, %v924_v9 }
  0xfb   : > { %vm438_vm1 = vcmp.eq.s32.totalorder %v391_v10, %v2419_v33  ;;  %2019 = vmatprep.mubr.msk.f32.mxu1 %vm2212_vm4, %v2209_v2 }
  0xfc   : > { %v1765_v13 = vsel %vm438_vm1, 1.0, %v2209_v2  ;;  %vm583_vm1 = vcmp.eq.s32.totalorder %v2595_v6, %v2419_v33 }
  0xfd   : > { %v645_v14 = vsub.f32 %v1742_v54, %v1765_v13  ;;  %v1795_v45 = vsel %vm583_vm1, 1.0, %v2209_v2  ;;  %v412_v54 = vpop.permute.xlu0 %411 }
  0xfe   : > { %vm445_vm7 = vcmp.eq.s32.totalorder %v412_v54, %v2419_v33 }
  0xff   : > { %v538_v15 = vpop.permute.xlu1 %537  ;;  %1938 = vmatmul.mubr.msk.f32.gmra.mrb[20].mxu0 %vm658_vm8, %v645_v14 }
 0x100   : > { %vm579_vm3 = vcmp.eq.s32.totalorder %v538_v15, %v2419_v33  ;;  %1940 = vmatprep.mubr.msk.f32.mxu0 %vm2212_vm4, %v2209_v2 }
 0x101   : > { %v1791_v17 = vsel %vm579_vm3, 1.0, %v2209_v2  ;;  %v415_v57 = vpop.permute.xlu0 %414 }
 0x102   : > { %v925_v18 = vsub.f32 %v1745_v16, %v1791_v17 }
 0x104   : > { %v394_v21 = vpop.permute.xlu1 %393  ;;  %2020 = vmatmul.mubr.msk.f32.gmra.mrb[26].mxu1 %vm658_vm8, %v925_v18 }
 0x105   : > { %vm439_vm6 = vcmp.eq.s32.totalorder %v394_v21, %v2419_v33  ;;  %2022 = vmatprep.mubr.msk.f32.mxu1 %vm2212_vm4, %v2209_v2  ;;  %v562_v9 = vpop.permute.xlu0 %561 }
 0x106   : > { %v1766_v23 = vsel %vm439_vm6, 1.0, %v2209_v2 }
 0x107   : > { %v646_v24 = vsub.f32 %v1743_v60, %v1766_v23  ;;  %v1772_v60 = vsel %vm445_vm7, 1.0, %v2209_v2 }
 0x109   : > { %v541_v29 = vpop.permute.xlu1 %540  ;;  %1941 = vmatmul.mubr.msk.f32.gmra.mrb[22].mxu0 %vm658_vm8, %v646_v24  ;;  %v565_v19 = vpop.permute.xlu0 %564 }
 0x10a   : > { %vm580_vm10 = vcmp.eq.s32.totalorder %v541_v29, %v2419_v33  ;;  %1943 = vmatprep.mubr.msk.f32.mxu0 %vm2212_vm4, %v2209_v2 }
 0x10b   : > { %v1792_v31 = vsel %vm580_vm10, 1.0, %v2209_v2  ;;  %vm309_vm10 = vcmp.eq.s32.totalorder %v280_v28, %v2419_v33 }
 0x10c   : > { %v926_v32 = vsub.f32 %v1746_v20, %v1792_v31  ;;  %v1751_v62 = vsel %vm309_vm10, 1.0, %v2209_v2  ;;  %vm1207_vm10 = vcmask 261120  }
 0x10d   : > { %1944 = vmatmul.mubr.msk.f32.gmra.mrb[24].mxu0 %vm658_vm8, %v647_v0 }
 0x10e   : > { %v268_v34 = vpop.permute.xlu1 %267  ;;  %2023 = vmatmul.mubr.msk.f32.gmra.mrb[28].mxu1 %vm658_vm8, %v926_v32  ;;  %1946 = vmatprep.mubr.msk.f32.mxu0 %vm2212_vm4, %v2209_v2 }
 0x10f   : > { %2025 = vmatprep.mubr.msk.f32.mxu1 %vm2212_vm4, %v2209_v2  ;;  %vm305_vm11 = vcmp.eq.s32.totalorder %v268_v34, %v2419_v33 }
 0x110   : > { %v1747_v36 = vsel %vm305_vm11, 1.0, %v2209_v2  ;;  %vm446_vm11 = vcmp.eq.s32.totalorder %v415_v57, %v2419_v33 }
 0x111   : > { %1947 = vmatmul.mubr.msk.f32.gmra.mrb[26].mxu0 %vm658_vm8, %v648_v22  ;;  %v1773_v4 = vsel %vm446_vm11, 1.0, %v2209_v2 }
 0x112   : > { %1949 = vmatprep.mubr.msk.f32.mxu0 %vm2212_vm4, %v2209_v2  ;;  %v653_v7 = vsub.f32 %v1750_v51, %v1773_v4 }
 0x113   : > { %v544_v35 = vpop.permute.xlu1 %543 }
 0x114   : > { %vm581_vm12 = vcmp.eq.s32.totalorder %v544_v35, %v2419_v33 }
 0x115   : > { %v1793_v37 = vsel %vm581_vm12, 1.0, %v2209_v2 }
 0x116   : > { %v927_v26 = vsub.f32 %v1747_v36, %v1793_v37 }
 0x118   : > { %v271_v38 = vpop.permute.xlu1 %270  ;;  %2026 = vmatmul.mubr.msk.f32.gmra.mrb[30].mxu1 %vm658_vm8, %v927_v26 }
 0x119   : > { %vm306_vm14 = vcmp.eq.s32.totalorder %v271_v38, %v2419_v33  ;;  %2028 = vmatprep.mubr.msk.f32.mxu1 %vm2212_vm4, %v2209_v2 }
 0x11a   : > { %v1748_v40 = vsel %vm306_vm14, 1.0, %v2209_v2 }
 0x11b   : > { %v928_v1 = vsub.f32 %v1748_v40, %v1794_v39 }
 0x11d   : > { %v403_v41 = vpop.permute.xlu1 %402  ;;  %2029 = vmatmul.mubr.msk.f32.gmra.mrb[32].mxu1 %vm658_vm8, %v928_v1 }
 0x11e   : > { %vm442_vm15 = vcmp.eq.s32.totalorder %v403_v41, %v2419_v33  ;;  %2031 = vmatprep.mubr.msk.f32.mxu1 %vm2212_vm4, %v2209_v2 }
 0x11f   : > { %v1769_v42 = vsel %vm442_vm15, 1.0, %v2209_v2  ;;  %vm587_vm15 = vcmp.eq.s32.totalorder %v562_v9, %v2419_v33 }
 0x120   : > { %v649_v43 = vsub.f32 %v1746_v20, %v1769_v42  ;;  %v1799_v14 = vsel %vm587_vm15, 1.0, %v2209_v2  ;;  %v424_v20 = vpop.permute.xlu0 %423 }
 0x122   : > { %v274_v11 = vpop.permute.xlu1 %273  ;;  %1950 = vmatmul.mubr.msk.f32.gmra.mrb[28].mxu0 %vm658_vm8, %v649_v43 }
 0x123   : > { %vm307_vm2 = vcmp.eq.s32.totalorder %v274_v11, %v2419_v33  ;;  %1952 = vmatprep.mubr.msk.f32.mxu0 %vm2212_vm4, %v2209_v2 }
 0x124   : > { %v1749_v46 = vsel %vm307_vm2, 1.0, %v2209_v2 }
 0x125   : > { %v929_v47 = vsub.f32 %v1749_v46, %v1795_v45  ;;  %v652_v63 = vsub.f32 %v1749_v46, %v1772_v60 }
 0x127   : > { %v406_v48 = vpop.permute.xlu1 %405  ;;  %2032 = vmatmul.mubr.msk.f32.gmra.mrb[34].mxu1 %vm658_vm8, %v929_v47 }
 0x128   : > { %vm443_vm3 = vcmp.eq.s32.totalorder %v406_v48, %v2419_v33  ;;  %2034 = vmatprep.mubr.msk.f32.mxu1 %vm2212_vm4, %v2209_v2 }
 0x129   : > { %v1770_v49 = vsel %vm443_vm3, 1.0, %v2209_v2  ;;  %vm588_vm3 = vcmp.eq.s32.totalorder %v565_v19, %v2419_v33 }
 0x12a   : > { %v650_v50 = vsub.f32 %v1747_v36, %v1770_v49  ;;  %v1800_v25 = vsel %vm588_vm3, 1.0, %v2209_v2 }
 0x12c   : > { %v553_v52 = vpop.permute.xlu1 %552  ;;  %1953 = vmatmul.mubr.msk.f32.gmra.mrb[30].mxu0 %vm658_vm8, %v650_v50 }
 0x12d   : > { %vm584_vm6 = vcmp.eq.s32.totalorder %v553_v52, %v2419_v33  ;;  %1955 = vmatprep.mubr.msk.f32.mxu0 %vm2212_vm4, %v2209_v2 }
 0x12e   : > { %v1796_v53 = vsel %vm584_vm6, 1.0, %v2209_v2  ;;  %vm449_vm6 = vcmp.eq.s32.totalorder %v424_v20, %v2419_v33 }
 0x12f   : > { %v930_v55 = vsub.f32 %v1750_v51, %v1796_v53  ;;  %v1776_v34 = vsel %vm449_vm6, 1.0, %v2209_v2 }
 0x131   : > { %v409_v56 = vpop.permute.xlu1 %408  ;;  %2035 = vmatmul.mubr.msk.f32.gmra.mrb[36].mxu1 %vm658_vm8, %v930_v55 }
 0x132   : > { %vm444_vm9 = vcmp.eq.s32.totalorder %v409_v56, %v2419_v33  ;;  %2037 = vmatprep.mubr.msk.f32.mxu1 %vm2212_vm4, %v2209_v2 }
 0x133   : > { %v1771_v58 = vsel %vm444_vm9, 1.0, %v2209_v2 }
 0x134   : > { %v651_v59 = vsub.f32 %v1748_v40, %v1771_v58 }
 0x136   : > { %v556_v61 = vpop.permute.xlu1 %555  ;;  %1956 = vmatmul.mubr.msk.f32.gmra.mrb[32].mxu0 %vm658_vm8, %v651_v59 }
 0x137   : > { %vm585_vm12 = vcmp.eq.s32.totalorder %v556_v61, %v2419_v33  ;;  %1958 = vmatprep.mubr.msk.f32.mxu0 %vm2212_vm4, %v2209_v2 }
 0x138   : > { %v1797_v3 = vsel %vm585_vm12, 1.0, %v2209_v2 }
 0x139   : > { %v931_v5 = vsub.f32 %v1751_v62, %v1797_v3 }
 0x13a   : > { %1959 = vmatmul.mubr.msk.f32.gmra.mrb[34].mxu0 %vm658_vm8, %v652_v63 }
 0x13b   : > { %v283_v6 = vpop.permute.xlu1 %282  ;;  %2038 = vmatmul.mubr.msk.f32.gmra.mrb[38].mxu1 %vm658_vm8, %v931_v5  ;;  %1961 = vmatprep.mubr.msk.f32.mxu0 %vm2212_vm4, %v2209_v2 }
 0x13c   : > { %2040 = vmatprep.mubr.msk.f32.mxu1 %vm2212_vm4, %v2209_v2  ;;  %vm310_vm13 = vcmp.eq.s32.totalorder %v283_v6, %v2419_v33 }
 0x13d   : > { %v1752_v10 = vsel %vm310_vm13, 1.0, %v2209_v2 }
 0x13e   : > { %1962 = vmatmul.mubr.msk.f32.gmra.mrb[36].mxu0 %vm658_vm8, %v653_v7 }
 0x13f   : > { %1964 = vmatprep.mubr.msk.f32.mxu0 %vm2212_vm4, %v2209_v2 }
 0x140   : > { %v559_v8 = vpop.permute.xlu1 %558 }
 0x141   : > { %vm586_vm14 = vcmp.eq.s32.totalorder %v559_v8, %v2419_v33 }
 0x142   : > { %v1798_v12 = vsel %vm586_vm14, 1.0, %v2209_v2 }
 0x143   : > { %v932_v13 = vsub.f32 %v1752_v10, %v1798_v12 }
 0x145   : > { %v286_v15 = vpop.permute.xlu1 %285  ;;  %2041 = vmatmul.mubr.msk.f32.gmra.mrb[40].mxu1 %vm658_vm8, %v932_v13 }
 0x146   : > { %vm311_vm1 = vcmp.eq.s32.totalorder %v286_v15, %v2419_v33  ;;  %2043 = vmatprep.mubr.msk.f32.mxu1 %vm2212_vm4, %v2209_v2 }
 0x147   : > { %v1753_v16 = vsel %vm311_vm1, 1.0, %v2209_v2 }
 0x148   : > { %v933_v17 = vsub.f32 %v1753_v16, %v1799_v14  ;;  %v656_v35 = vsub.f32 %v1753_v16, %v1776_v34 }
 0x14a   : > { %v418_v18 = vpop.permute.xlu1 %417  ;;  %2044 = vmatmul.mubr.msk.f32.gmra.mrb[42].mxu1 %vm658_vm8, %v933_v17 }
 0x14b   : > { %vm447_vm2 = vcmp.eq.s32.totalorder %v418_v18, %v2419_v33  ;;  %2046 = vmatprep.mubr.msk.f32.mxu1 %vm2212_vm4, %v2209_v2 }
 0x14c   : > { %v1774_v21 = vsel %vm447_vm2, 1.0, %v2209_v2 }
 0x14d   : > { %v654_v23 = vsub.f32 %v1751_v62, %v1774_v21 }
 0x14f   : > { %v289_v24 = vpop.permute.xlu1 %288  ;;  %1965 = vmatmul.mubr.msk.f32.gmra.mrb[38].mxu0 %vm658_vm8, %v654_v23 }
 0x150   : > { %vm312_vm5 = vcmp.eq.s32.totalorder %v289_v24, %v2419_v33  ;;  %1967 = vmatprep.mubr.msk.f32.mxu0 %vm2212_vm4, %v2209_v2 }
 0x151   : > { %v1754_v29 = vsel %vm312_vm5, 1.0, %v2209_v2 }
 0x152   : > { %v934_v0 = vsub.f32 %v1754_v29, %v1800_v25 }
 0x154   : > { %v421_v31 = vpop.permute.xlu1 %420  ;;  %2047 = vmatmul.mubr.msk.f32.gmra.mrb[44].mxu1 %vm658_vm8, %v934_v0 }
 0x155   : > { %vm448_vm7 = vcmp.eq.s32.totalorder %v421_v31, %v2419_v33 }
 0x156   : > { %v1775_v27 = vsel %vm448_vm7, 1.0, %v2209_v2 }
 0x157   : > { %v655_v32 = vsub.f32 %v1752_v10, %v1775_v27 }
 0x158   : > { %v427_v22 = vpop.permute.xlu1 %426 }
 0x159   : > { %vm450_vm9 = vcmp.eq.s32.totalorder %v427_v22, %v2419_v33  ;;  %1968 = vmatmul.mubr.msk.f32.gmra.mrb[40].mxu0 %vm658_vm8, %v655_v32 }
 0x15a   : > { %1970 = vmatprep.mubr.msk.f32.mxu0 %vm2212_vm4, %v2209_v2  ;;  %v1777_v36 = vsel %vm450_vm9, 1.0, %v2209_v2 }
 0x15b   : > { %v657_v37 = vsub.f32 %v1754_v29, %v1777_v36 }
 0x15d   : > { %1971 = vmatmul.mubr.msk.f32.gmra.mrb[42].mxu0 %vm658_vm8, %v656_v35 }
 0x15e   : > { %1973 = vmatprep.mubr.msk.f32.mxu0 %vm2212_vm4, %v2209_v2 }
 0x161   : > { %1974 = vmatmul.mubr.msk.f32.gmra.mrb[44].mxu0 %vm658_vm8, %v657_v37 }
 0x172   : > { %v1070_v26 = vpop.f32.mrb[0].mxu1 }
 0x173   : > { %v1982_v38 = vpop.f32.mrb[1].mxu1  ;;  %v1277_v1 = vmul.f32 %v1070_v26, %v1070_v26 }
 0x175   : > { %v1300_v45 = vsel %vm1207_vm10, %v1277_v1, 0.0 }
 0x176   : > { %v1075_v39 = vpop.f32.mrb[2].mxu1 }
 0x177   : > { %v1985_v33 = vpop.f32.mrb[3].mxu1  ;;  %v1278_v51 = vmul.f32 %v1075_v39, %v1075_v39 }
 0x178   : > { %v798_v40 = vpop.f32.mrb[0].mxu0 }
 0x179   : > { %v1184_v41 = vmul.f32 %v798_v40, %v798_v40  ;;  %v1909_v42 = vpop.f32.mrb[1].mxu0  ;;  %v1303_v58 = vsel %vm1207_vm10, %v1278_v51, 0.0 }
 0x17a   : > { %v1080_v43 = vpop.f32.mrb[4].mxu1 }
 0x17b   : > { %v1988_v11 = vpop.f32.mrb[5].mxu1  ;;  %v1208_v44 = vsel %vm1207_vm10, %v1184_v41, 0.0  ;;  %v1279_v46 = vmul.f32 %v1080_v43, %v1080_v43 }
 0x17c   : > { %1209 = vadd.xlane.f32.xlu1 %v1208_v44 }
 0x17d   : > { %v1306_v50 = vsel %vm1207_vm10, %v1279_v46, 0.0 }
 0x17e   : > { %v1085_v2 = vpop.f32.mrb[6].mxu1 }
 0x17f   : > { %v1991_v47 = vpop.f32.mrb[7].mxu1  ;;  %v1280_v62 = vmul.f32 %v1085_v2, %v1085_v2 }
 0x180   : > { %1301 = vadd.xlane.f32.xlu1 %v1300_v45 }
 0x181   : > { %v1309_v6 = vsel %vm1207_vm10, %v1280_v62, 0.0 }
 0x182   : > { %v803_v48 = vpop.f32.mrb[2].mxu0 }
 0x183   : > { %v1185_v28 = vmul.f32 %v803_v48, %v803_v48  ;;  %v1912_v49 = vpop.f32.mrb[3].mxu0 }
 0x184   : > { %1307 = vadd.xlane.f32.xlu1 %v1306_v50 }
 0x185   : > { %v1211_v52 = vsel %vm1207_vm10, %v1185_v28, 0.0 }
 0x186   : > { %1212 = vadd.xlane.f32.xlu0 %v1211_v52 }
 0x187   : > { %v808_v53 = vpop.f32.mrb[4].mxu0  ;;  %v1090_v54 = vpop.f32.mrb[8].mxu1 }
 0x188   : > { %v1915_v55 = vpop.f32.mrb[5].mxu0  ;;  %v1994_v56 = vpop.f32.mrb[9].mxu1  ;;  %v1186_v57 = vmul.f32 %v808_v53, %v808_v53  ;;  %v1281_v3 = vmul.f32 %v1090_v54, %v1090_v54 }
 0x18a   : > { %1304 = vadd.xlane.f32.xlu0 %v1303_v58  ;;  %v1214_v63 = vsel %vm1207_vm10, %v1186_v57, 0.0  ;;  %v1312_v8 = vsel %vm1207_vm10, %v1281_v3, 0.0 }
 0x18b   : > { %v813_v59 = vpop.f32.mrb[6].mxu0 }
 0x18c   : > { %v1187_v60 = vmul.f32 %v813_v59, %v813_v59  ;;  %v1918_v61 = vpop.f32.mrb[7].mxu0 }
 0x18e   : > { %1215 = vadd.xlane.f32.xlu0 %v1214_v63  ;;  %v1217_v4 = vsel %vm1207_vm10, %v1187_v60, 0.0 }
 0x18f   : > { %1218 = vadd.xlane.f32.xlu1 %v1217_v4 }
 0x191   : > { %v1095_v5 = vpop.f32.mrb[10].mxu1 }
 0x192   : > { %v1997_v7 = vpop.f32.mrb[11].mxu1  ;;  %1310 = vadd.xlane.f32.xlu0 %v1309_v6  ;;  %v1282_v13 = vmul.f32 %v1095_v5, %v1095_v5 }
 0x193   : > { %1313 = vadd.xlane.f32.xlu1 %v1312_v8 }
 0x194   : > { %v1315_v18 = vsel %vm1207_vm10, %v1282_v13, 0.0 }
 0x19b   : > { %v818_v9 = vpop.f32.mrb[8].mxu0 }
 0x19c   : > { %v1188_v10 = vmul.f32 %v818_v9, %v818_v9  ;;  %v1921_v12 = vpop.f32.mrb[9].mxu0 }
 0x19e   : > { %v1220_v14 = vsel %vm1207_vm10, %v1188_v10, 0.0 }
 0x19f   : > { %1221 = vadd.xlane.f32.xlu0 %v1220_v14 }
 0x1a0   : > { %v1100_v15 = vpop.f32.mrb[12].mxu1 }
 0x1a1   : > { %v1283_v16 = vmul.f32 %v1100_v15, %v1100_v15  ;;  %v2000_v17 = vpop.f32.mrb[13].mxu1 }
 0x1a3   : > { %1316 = vadd.xlane.f32.xlu0 %v1315_v18  ;;  %v1318_v19 = vsel %vm1207_vm10, %v1283_v16, 0.0 }
 0x1a4   : > { %1319 = vadd.xlane.f32.xlu1 %v1318_v19  ;;  %v1105_v21 = vpop.f32.mrb[14].mxu1 }
 0x1a5   : > { %v823_v23 = vpop.f32.mrb[10].mxu0  ;;  %v2003_v24 = vpop.f32.mrb[15].mxu1  ;;  %v1284_v20 = vmul.f32 %v1105_v21, %v1105_v21 }
 0x1a6   : > { %v1189_v25 = vmul.f32 %v823_v23, %v823_v23  ;;  %v1924_v29 = vpop.f32.mrb[11].mxu0 }
 0x1a7   : > { %v1321_v32 = vsel %vm1207_vm10, %v1284_v20, 0.0 }
 0x1a8   : > { %v1223_v0 = vsel %vm1207_vm10, %v1189_v25, 0.0 }
 0x1a9   : > { %1224 = vadd.xlane.f32.xlu0 %v1223_v0 }
 0x1aa   : > { %v1110_v31 = vpop.f32.mrb[16].mxu1 }
 0x1ab   : > { %v2006_v27 = vpop.f32.mrb[17].mxu1  ;;  %v1285_v36 = vmul.f32 %v1110_v31, %v1110_v31 }
 0x1ad   : > { %1322 = vadd.xlane.f32.xlu0 %v1321_v32  ;;  %v1324_v42 = vsel %vm1207_vm10, %v1285_v36, 0.0 }
 0x1af   : > { %v828_v34 = vpop.f32.mrb[12].mxu0 }
 0x1b0   : > { %v1190_v22 = vmul.f32 %v828_v34, %v828_v34  ;;  %v1927_v35 = vpop.f32.mrb[13].mxu0 }
 0x1b2   : > { %v1226_v37 = vsel %vm1207_vm10, %v1190_v22, 0.0 }
 0x1b3   : > { %v833_v26 = vpop.f32.mrb[14].mxu0  ;;  %1227 = vadd.xlane.f32.xlu1 %v1226_v37 }
 0x1b4   : > { %v1191_v38 = vmul.f32 %v833_v26, %v833_v26  ;;  %v1930_v39 = vpop.f32.mrb[15].mxu0  ;;  %v1115_v33 = vpop.f32.mrb[18].mxu1 }
 0x1b5   : > { %v2009_v40 = vpop.f32.mrb[19].mxu1  ;;  %v1286_v1 = vmul.f32 %v1115_v33, %v1115_v33 }
 0x1b6   : > { %v1229_v41 = vsel %vm1207_vm10, %v1191_v38, 0.0 }
 0x1b7   : > { %1230 = vadd.xlane.f32.xlu0 %v1229_v41  ;;  %1325 = vadd.xlane.f32.xlu1 %v1324_v42  ;;  %v838_v43 = vpop.f32.mrb[16].mxu0  ;;  %v1327_v45 = vsel %vm1207_vm10, %v1286_v1, 0.0 }
 0x1b8   : > { %v1192_v11 = vmul.f32 %v838_v43, %v838_v43  ;;  %v1933_v44 = vpop.f32.mrb[17].mxu0 }
 0x1ba   : > { %v1232_v2 = vsel %vm1207_vm10, %v1192_v11, 0.0 }
 0x1bb   : > { %1328 = vadd.xlane.f32.xlu0 %v1327_v45  ;;  %1233 = vadd.xlane.f32.xlu1 %v1232_v2 }
 0x1be   : > { %v1120_v46 = vpop.f32.mrb[20].mxu1 }
 0x1bf   : > { %v1287_v47 = vmul.f32 %v1120_v46, %v1120_v46  ;;  %v2012_v48 = vpop.f32.mrb[21].mxu1 }
 0x1c1   : > { %v1330_v28 = vsel %vm1207_vm10, %v1287_v47, 0.0 }
 0x1c2   : > { %1331 = vadd.xlane.f32.xlu1 %v1330_v28 }
 0x1c3   : > { %v1125_v49 = vpop.f32.mrb[22].mxu1 }
 0x1c4   : > { %v2015_v50 = vpop.f32.mrb[23].mxu1  ;;  %v1288_v54 = vmul.f32 %v1125_v49, %v1125_v49 }
 0x1c6   : > { %v1333_v58 = vsel %vm1207_vm10, %v1288_v54, 0.0 }
 0x1c8   : > { %v843_v51 = vpop.f32.mrb[18].mxu0 }
 0x1c9   : > { %v1193_v52 = vmul.f32 %v843_v51, %v843_v51  ;;  %v1936_v53 = vpop.f32.mrb[19].mxu0 }
 0x1cb   : > { %v1235_v55 = vsel %vm1207_vm10, %v1193_v52, 0.0 }
 0x1cc   : > { %1236 = vadd.xlane.f32.xlu0 %v1235_v55 }
 0x1cd   : > { %v1130_v56 = vpop.f32.mrb[24].mxu1 }
 0x1ce   : > { %v2018_v57 = vpop.f32.mrb[25].mxu1  ;;  %v1289_v62 = vmul.f32 %v1130_v56, %v1130_v56 }
 0x1d0   : > { %1334 = vadd.xlane.f32.xlu0 %v1333_v58  ;;  %v1336_v5 = vsel %vm1207_vm10, %v1289_v62, 0.0 }
 0x1d2   : > { %v848_v59 = vpop.f32.mrb[20].mxu0 }
 0x1d3   : > { %v1194_v60 = vmul.f32 %v848_v59, %v848_v59  ;;  %v1939_v61 = vpop.f32.mrb[21].mxu0 }
 0x1d5   : > { %v1238_v63 = vsel %vm1207_vm10, %v1194_v60, 0.0 }
 0x1d6   : > { %1239 = vadd.xlane.f32.xlu1 %v1238_v63 }
 0x1d7   : > { %v1135_v3 = vpop.f32.mrb[26].mxu1 }
 0x1d8   : > { %v2021_v4 = vpop.f32.mrb[27].mxu1  ;;  %v1290_v9 = vmul.f32 %v1135_v3, %v1135_v3 }
 0x1da   : > { %1337 = vadd.xlane.f32.xlu1 %v1336_v5  ;;  %v1339_v19 = vsel %vm1207_vm10, %v1290_v9, 0.0 }
 0x1dc   : > { %v853_v6 = vpop.f32.mrb[22].mxu0 }
 0x1dd   : > { %v1195_v7 = vmul.f32 %v853_v6, %v853_v6  ;;  %v1942_v8 = vpop.f32.mrb[23].mxu0 }
 0x1df   : > { %v1241_v10 = vsel %vm1207_vm10, %v1195_v7, 0.0 }
 0x1e0   : > { %v858_v12 = vpop.f32.mrb[24].mxu0  ;;  %1242 = vadd.xlane.f32.xlu0 %v1241_v10 }
 0x1e1   : > { %v1196_v13 = vmul.f32 %v858_v12, %v858_v12  ;;  %v1945_v14 = vpop.f32.mrb[25].mxu0  ;;  %v1140_v15 = vpop.f32.mrb[28].mxu1 }
 0x1e2   : > { %v2024_v16 = vpop.f32.mrb[29].mxu1  ;;  %v1291_v17 = vmul.f32 %v1140_v15, %v1140_v15 }
 0x1e3   : > { %v1244_v18 = vsel %vm1207_vm10, %v1196_v13, 0.0 }
 0x1e4   : > { %1245 = vadd.xlane.f32.xlu1 %v1244_v18  ;;  %1340 = vadd.xlane.f32.xlu0 %v1339_v19  ;;  %v863_v21 = vpop.f32.mrb[26].mxu0  ;;  %v1342_v29 = vsel %vm1207_vm10, %v1291_v17, 0.0 }
 0x1e5   : > { %v1197_v23 = vmul.f32 %v863_v21, %v863_v21  ;;  %v1948_v24 = vpop.f32.mrb[27].mxu0 }
 0x1e7   : > { %v1247_v25 = vsel %vm1207_vm10, %v1197_v23, 0.0 }
 0x1e8   : > { %1248 = vadd.xlane.f32.xlu0 %v1247_v25  ;;  %1343 = vadd.xlane.f32.xlu1 %v1342_v29 }
 0x1eb   : > { %v1145_v20 = vpop.f32.mrb[30].mxu1 }
 0x1ec   : > { %v1292_v0 = vmul.f32 %v1145_v20, %v1145_v20  ;;  %v2027_v31 = vpop.f32.mrb[31].mxu1 }
 0x1ee   : > { %v1345_v27 = vsel %vm1207_vm10, %v1292_v0, 0.0 }
 0x1ef   : > { %1346 = vadd.xlane.f32.xlu0 %v1345_v27 }
 0x1f0   : > { %v1150_v32 = vpop.f32.mrb[32].mxu1 }
 0x1f1   : > { %v2030_v34 = vpop.f32.mrb[33].mxu1  ;;  %v1293_v37 = vmul.f32 %v1150_v32, %v1150_v32 }
 0x1f3   : > { %v1348_v33 = vsel %vm1207_vm10, %v1293_v37, 0.0 }
 0x1f5   : > { %v868_v22 = vpop.f32.mrb[28].mxu0 }
 0x1f6   : > { %v1198_v35 = vmul.f32 %v868_v22, %v868_v22  ;;  %v1951_v36 = vpop.f32.mrb[29].mxu0 }
 0x1f8   : > { %v1250_v26 = vsel %vm1207_vm10, %v1198_v35, 0.0 }
 0x1f9   : > { %1251 = vadd.xlane.f32.xlu1 %v1250_v26 }
 0x1fa   : > { %v1155_v38 = vpop.f32.mrb[34].mxu1 }
 0x1fb   : > { %v2033_v39 = vpop.f32.mrb[35].mxu1  ;;  %v1294_v42 = vmul.f32 %v1155_v38, %v1155_v38 }
 0x1fd   : > { %1349 = vadd.xlane.f32.xlu1 %v1348_v33  ;;  %v1351_v45 = vsel %vm1207_vm10, %v1294_v42, 0.0 }
 0x1ff   : > { %v873_v40 = vpop.f32.mrb[30].mxu0 }
 0x200   : > { %v1199_v1 = vmul.f32 %v873_v40, %v873_v40  ;;  %v1954_v41 = vpop.f32.mrb[31].mxu0 }
 0x202   : > { %v1253_v43 = vsel %vm1207_vm10, %v1199_v1, 0.0 }
 0x203   : > { %1254 = vadd.xlane.f32.xlu0 %v1253_v43 }
 0x204   : > { %v1160_v11 = vpop.f32.mrb[36].mxu1 }
 0x205   : > { %v2036_v44 = vpop.f32.mrb[37].mxu1  ;;  %v1295_v28 = vmul.f32 %v1160_v11, %v1160_v11 }
 0x207   : > { %1352 = vadd.xlane.f32.xlu0 %v1351_v45  ;;  %v1354_v56 = vsel %vm1207_vm10, %v1295_v28, 0.0 }
 0x209   : > { %v1210_v2 = vpop.xlane.xlu1 %1209  ;;  %v878_v46 = vpop.f32.mrb[32].mxu0 }
 0x20a   : > { %v1200_v47 = vmul.f32 %v878_v46, %v878_v46  ;;  %v1957_v48 = vpop.f32.mrb[33].mxu0 }
 0x20c   : > { %v1256_v49 = vsel %vm1207_vm10, %v1200_v47, 0.0 }
 0x20d   : > { %v1302_v50 = vpop.xlane.xlu1 %1301  ;;  %1257 = vadd.xlane.f32.xlu1 %v1256_v49  ;;  %v883_v51 = vpop.f32.mrb[34].mxu0 }
 0x20e   : > { %2137 = vrcp.f32 %v1302_v50  ;;  %v1960_v52 = vpop.f32.mrb[35].mxu0  ;;  %v1165_v53 = vpop.f32.mrb[38].mxu1  ;;  %v1201_v17 = vmul.f32 %v883_v51, %v883_v51 }
 0x20f   : > { %v1296_v54 = vmul.f32 %v1165_v53, %v1165_v53  ;;  %v2039_v55 = vpop.f32.mrb[39].mxu1 }
 0x210   : > { %v1259_v20 = vsel %vm1207_vm10, %v1201_v17, 0.0 }
 0x211   : > { %v1308_v57 = vpop.xlane.xlu1 %1307  ;;  %1355 = vadd.xlane.f32.xlu1 %v1354_v56  ;;  %v888_v58 = vpop.f32.mrb[36].mxu0  ;;  %v1357_v59 = vsel %vm1207_vm10, %v1296_v54, 0.0 }
 0x212   : > { %2139 = vrcp.f32 %v1308_v57  ;;  %1358 = vadd.xlane.f32.xlu0 %v1357_v59  ;;  %v1963_v60 = vpop.f32.mrb[37].mxu0  ;;  %v1202_v22 = vmul.f32 %v888_v58, %v888_v58 }
 0x213   : > { %v1213_v61 = vpop.xlane.xlu0 %1212 }
 0x214   : > { %v1262_v1 = vsel %vm1207_vm10, %v1202_v22, 0.0 }
 0x217   : > { %v1305_v62 = vpop.xlane.xlu0 %1304 }
 0x218   : > { %v2138_v63 = vpop.eup %2137  ;;  %2141 = vrcp.f32 %v1305_v62  ;;  %v1170_v3 = vpop.f32.mrb[40].mxu1 }
 0x219   : > { %v2777_v4 = vadd.f32 %v2138_v63, %v1210_v2  ;;  %v1297_v5 = vmul.f32 %v1170_v3, %v1170_v3  ;;  %v2042_v6 = vpop.f32.mrb[41].mxu1 }
 0x21b   : > { %v1216_v7 = vpop.xlane.xlu0 %1215  ;;  %v1360_v8 = vsel %vm1207_vm10, %v1297_v5, 0.0 }
 0x21c   : > { %v2140_v9 = vpop.eup %2139  ;;  %v1219_v10 = vpop.xlane.xlu1 %1218  ;;  %1361 = vadd.xlane.f32.xlu1 %v1360_v8 }
 0x21d   : > { %v2780_v12 = vadd.f32 %v2140_v9, %v1216_v7  ;;  %v1175_v13 = vpop.f32.mrb[42].mxu1 }
 0x21e   : > { %v1298_v14 = vmul.f32 %v1175_v13, %v1175_v13  ;;  %v2045_v15 = vpop.f32.mrb[43].mxu1 }
 0x21f   : > { %v1311_v16 = vpop.xlane.xlu0 %1310 }
 0x220   : > { %2143 = vrcp.f32 %v1311_v16  ;;  %v1314_v18 = vpop.xlane.xlu1 %1313  ;;  %v1363_v19 = vsel %vm1207_vm10, %v1298_v14, 0.0 }
 0x221   : > { %2145 = vrcp.f32 %v1314_v18  ;;  %1364 = vadd.xlane.f32.xlu0 %v1363_v19 }
 0x222   : > { %v2142_v21 = vpop.eup %2141  ;;  %v893_v23 = vpop.f32.mrb[38].mxu0 }
 0x223   : > { %v2783_v24 = vadd.f32 %v2142_v21, %v1213_v61  ;;  %v1966_v25 = vpop.f32.mrb[39].mxu0  ;;  %v1203_v29 = vmul.f32 %v893_v23, %v893_v23 }
 0x225   : > { %1260 = vadd.xlane.f32.xlu0 %v1259_v20  ;;  %v1265_v32 = vsel %vm1207_vm10, %v1203_v29, 0.0 }
 0x227   : > { %v1180_v0 = vpop.f32.mrb[44].mxu1 }
 0x228   : > { %v1299_v31 = vmul.f32 %v1180_v0, %v1180_v0  ;;  %v2048_v27 = vpop.f32.mrb[45].mxu1 }
 0x229   : > { %1266 = vadd.xlane.f32.xlu0 %v1265_v32 }
 0x22a   : > { %v2144_v34 = vpop.eup %2143  ;;  %v1366_v35 = vsel %vm1207_vm10, %v1299_v31, 0.0 }
 0x22b   : > { %v2146_v36 = vpop.eup %2145  ;;  %v2788_v37 = vadd.f32 %v2144_v34, %v1219_v10  ;;  %1367 = vadd.xlane.f32.xlu1 %v1366_v35 }
 0x22c   : > { %v898_v26 = vpop.f32.mrb[40].mxu0  ;;  %v1222_v38 = vpop.xlane.xlu0 %1221 }
 0x22d   : > { %v2790_v39 = vadd.f32 %v2146_v36, %v1222_v38  ;;  %v1969_v33 = vpop.f32.mrb[41].mxu0  ;;  %v1204_v40 = vmul.f32 %v898_v26, %v898_v26 }
 0x22f   : > { %1263 = vadd.xlane.f32.xlu1 %v1262_v1  ;;  %v1268_v44 = vsel %vm1207_vm10, %v1204_v40, 0.0 }
 0x230   : > { %v903_v41 = vpop.f32.mrb[42].mxu0  ;;  %v1317_v42 = vpop.xlane.xlu0 %1316 }
 0x231   : > { %v1205_v43 = vmul.f32 %v903_v41, %v903_v41  ;;  %2147 = vrcp.f32 %v1317_v42  ;;  %v1972_v11 = vpop.f32.mrb[43].mxu0  ;;  %v1320_v45 = vpop.xlane.xlu1 %1319 }
 0x232   : > { %2149 = vrcp.f32 %v1320_v45 }
 0x233   : > { %1269 = vadd.xlane.f32.xlu1 %v1268_v44  ;;  %v1271_v2 = vsel %vm1207_vm10, %v1205_v43, 0.0 }
 0x234   : > { %1272 = vadd.xlane.f32.xlu0 %v1271_v2  ;;  %v908_v46 = vpop.f32.mrb[44].mxu0 }
 0x235   : > { %v1206_v47 = vmul.f32 %v908_v46, %v908_v46  ;;  %v1975_v48 = vpop.f32.mrb[45].mxu0 }
 0x236   : > { %v1225_v28 = vpop.xlane.xlu0 %1224 }
 0x237   : > { %v1274_v49 = vsel %vm1207_vm10, %v1206_v47, 0.0 }
 0x238   : > { %1275 = vadd.xlane.f32.xlu1 %v1274_v49 }
 0x23a   : > { %v1323_v50 = vpop.xlane.xlu0 %1322 }
 0x23b   : > { %v2148_v51 = vpop.eup %2147  ;;  %2151 = vrcp.f32 %v1323_v50 }
 0x23c   : > { %v2796_v52 = vadd.f32 %v2148_v51, %v1225_v28  ;;  %v2150_v53 = vpop.eup %2149 }
 0x240   : > { %v1228_v54 = vpop.xlane.xlu1 %1227 }
 0x241   : > { %v2798_v55 = vadd.f32 %v2150_v53, %v1228_v54 }
 0x244   : > { %v1326_v56 = vpop.xlane.xlu1 %1325  ;;  %v1231_v57 = vpop.xlane.xlu0 %1230 }
 0x245   : > { %v2152_v58 = vpop.eup %2151  ;;  %2153 = vrcp.f32 %v1326_v56 }
 0x246   : > { %v2801_v59 = vadd.f32 %v2152_v58, %v1231_v57 }
 0x248   : > { %v1329_v60 = vpop.xlane.xlu0 %1328  ;;  %v1234_v62 = vpop.xlane.xlu1 %1233 }
 0x249   : > { %2155 = vrcp.f32 %v1329_v60 }
 0x24f   : > { %v2154_v61 = vpop.eup %2153  ;;  %v1332_v3 = vpop.xlane.xlu1 %1331 }
 0x250   : > { %v2807_v63 = vadd.f32 %v2154_v61, %v1234_v62  ;;  %2157 = vrcp.f32 %v1332_v3 }
 0x253   : > { %v2156_v5 = vpop.eup %2155 }
 0x259   : > { %v1237_v6 = vpop.xlane.xlu0 %1236 }
 0x25a   : > { %v2809_v7 = vadd.f32 %v2156_v5, %v1237_v6  ;;  %v2158_v9 = vpop.eup %2157  ;;  %v1422_v5 = vld [vmem:[%s2260_s20] sm:$0xff] (!%p1849_p5)  ;;  %v1423_v6 = vld [vmem:[%s2260_s20 + $0x8] sm:$0xff] (!%p1849_p5) }
 0x25d   : > { %v1335_v8 = vpop.xlane.xlu0 %1334 }
 0x25e   : > { %2159 = vrcp.f32 %v1335_v8  ;;  %v1424_v8 = vld [vmem:[%s2260_s20 + $0x10] sm:$0xff] (!%p1849_p5) }
 0x263   : > { %v1240_v10 = vpop.xlane.xlu1 %1239 }
 0x264   : > { %v2811_v13 = vadd.f32 %v2158_v9, %v1240_v10  ;;  %v1445_v9 = vadd.f32 (!%p1849_p5), %v1422_v5, %v2777_v4  ;;  %v1446_v10 = vadd.f32 (!%p1849_p5), %v1423_v6, %v2783_v24 }
 0x266   : > { %1469 = vst.msk [vmem:[%s2260_s20] sm:$0xff] (!%p1849_p5), %vm170_vm0, %v1445_v9  ;;  %1470 = vst.msk [vmem:[%s2260_s20 + $0x8] sm:$0xff] (!%p1849_p5), %vm170_vm0, %v1446_v10  ;;  %v1444_v9 = vld [vmem:[%s2260_s20 + $0xb0] sm:$0xff] (!%p1849_p5) }
 0x267   : > { %v1338_v14 = vpop.xlane.xlu1 %1337 }
 0x268   : > { %2161 = vrcp.f32 %v1338_v14  ;;  %v2160_v15 = vpop.eup %2159  ;;  %v1447_v14 = vadd.f32 (!%p1849_p5), %v1424_v8, %v2780_v12  ;;  %v1443_v8 = vld [vmem:[%s2260_s20 + $0xa8] sm:$0xff] (!%p1849_p5) }
 0x26a   : > { %1471 = vst.msk [vmem:[%s2260_s20 + $0x10] sm:$0xff] (!%p1849_p5), %vm170_vm0, %v1447_v14 }
 0x26d   : > { %v1243_v16 = vpop.xlane.xlu0 %1242 }
 0x26e   : > { %v2813_v17 = vadd.f32 %v2160_v15, %v1243_v16  ;;  %v1425_v15 = vld [vmem:[%s2260_s20 + $0x18] sm:$0xff] (!%p1849_p5)  ;;  %v1426_v16 = vld [vmem:[%s2260_s20 + $0x20] sm:$0xff] (!%p1849_p5) }
 0x271   : > { %v1246_v18 = vpop.xlane.xlu1 %1245  ;;  %v1341_v19 = vpop.xlane.xlu0 %1340 }
 0x272   : > { %v2162_v21 = vpop.eup %2161  ;;  %2163 = vrcp.f32 %v1341_v19  ;;  %v1448_v19 = vadd.f32 (!%p1849_p5), %v1425_v15, %v2788_v37 }
 0x273   : > { %v2815_v23 = vadd.f32 %v2162_v21, %v1246_v18  ;;  %v1427_v18 = vld [vmem:[%s2260_s20 + $0x28] sm:$0xff] (!%p1849_p5)  ;;  %v1449_v21 = vadd.f32 (!%p1849_p5), %v1426_v16, %v2790_v39 }
 0x274   : > { %1472 = vst.msk [vmem:[%s2260_s20 + $0x18] sm:$0xff] (!%p1849_p5), %vm170_vm0, %v1448_v19 }
 0x275   : > { %v1344_v25 = vpop.xlane.xlu1 %1343  ;;  %v1249_v20 = vpop.xlane.xlu0 %1248  ;;  %1473 = vst.msk [vmem:[%s2260_s20 + $0x20] sm:$0xff] (!%p1849_p5), %vm170_vm0, %v1449_v21 }
 0x276   : > { %2165 = vrcp.f32 %v1344_v25  ;;  %v1450_v25 = vadd.f32 (!%p1849_p5), %v1427_v18, %v2796_v52 }
 0x278   : > { %1474 = vst.msk [vmem:[%s2260_s20 + $0x28] sm:$0xff] (!%p1849_p5), %vm170_vm0, %v1450_v25 }
 0x27c   : > { %v2164_v29 = vpop.eup %2163  ;;  %v1347_v31 = vpop.xlane.xlu0 %1346 }
 0x27d   : > { %v2817_v0 = vadd.f32 %v2164_v29, %v1249_v20  ;;  %2167 = vrcp.f32 %v1347_v31  ;;  %v1428_v29 = vld [vmem:[%s2260_s20 + $0x30] sm:$0xff] (!%p1849_p5)  ;;  %v1429_v20 = vld [vmem:[%s2260_s20 + $0x38] sm:$0xff] (!%p1849_p5)  ;;  %v1430_v31 = vld [vmem:[%s2260_s20 + $0x40] sm:$0xff] (!%p1849_p5) }
 0x280   : > { %v2166_v27 = vpop.eup %2165 }
 0x286   : > { %v1252_v32 = vpop.xlane.xlu1 %1251 }
 0x287   : > { %v2819_v34 = vadd.f32 %v2166_v27, %v1252_v32  ;;  %v2168_v35 = vpop.eup %2167  ;;  %v1451_v27 = vadd.f32 (!%p1849_p5), %v1428_v29, %v2798_v55  ;;  %v1452_v32 = vadd.f32 (!%p1849_p5), %v1429_v20, %v2801_v59 }
 0x289   : > { %1475 = vst.msk [vmem:[%s2260_s20 + $0x30] sm:$0xff] (!%p1849_p5), %vm170_vm0, %v1451_v27  ;;  %1476 = vst.msk [vmem:[%s2260_s20 + $0x38] sm:$0xff] (!%p1849_p5), %vm170_vm0, %v1452_v32 }
 0x28a   : > { %v1350_v22 = vpop.xlane.xlu1 %1349 }
 0x28b   : > { %2169 = vrcp.f32 %v1350_v22  ;;  %v1453_v22 = vadd.f32 (!%p1849_p5), %v1430_v31, %v2807_v63 }
 0x28d   : > { %1477 = vst.msk [vmem:[%s2260_s20 + $0x40] sm:$0xff] (!%p1849_p5), %vm170_vm0, %v1453_v22 }
 0x290   : > { %v1255_v36 = vpop.xlane.xlu0 %1254 }
 0x291   : > { %v2821_v26 = vadd.f32 %v2168_v35, %v1255_v36  ;;  %v1431_v35 = vld [vmem:[%s2260_s20 + $0x48] sm:$0xff] (!%p1849_p5)  ;;  %v1432_v36 = vld [vmem:[%s2260_s20 + $0x50] sm:$0xff] (!%p1849_p5) }
 0x294   : > { %v1353_v1 = vpop.xlane.xlu0 %1352 }
 0x295   : > { %v2170_v38 = vpop.eup %2169  ;;  %2171 = vrcp.f32 %v1353_v1  ;;  %v1455_v1 = vadd.f32 (!%p1849_p5), %v1432_v36, %v2811_v13 }
 0x297   : > { %1479 = vst.msk [vmem:[%s2260_s20 + $0x50] sm:$0xff] (!%p1849_p5), %vm170_vm0, %v1455_v1 }
 0x29a   : > { %v1258_v33 = vpop.xlane.xlu1 %1257 }
 0x29b   : > { %v2823_v40 = vadd.f32 %v2170_v38, %v1258_v33  ;;  %v1433_v38 = vld [vmem:[%s2260_s20 + $0x58] sm:$0xff] (!%p1849_p5)  ;;  %v1454_v33 = vadd.f32 (!%p1849_p5), %v1431_v35, %v2809_v7 }
 0x29d   : > { %1478 = vst.msk [vmem:[%s2260_s20 + $0x48] sm:$0xff] (!%p1849_p5), %vm170_vm0, %v1454_v33 }
 0x29e   : > { %v1356_v43 = vpop.xlane.xlu1 %1355 }
 0x29f   : > { %v1359_v41 = vpop.xlane.xlu0 %1358  ;;  %v2172_v11 = vpop.eup %2171 }
 0x2a0   : > { %2173 = vrcp.f32 %v1359_v41  ;;  %v1456_v41 = vadd.f32 (!%p1849_p5), %v1433_v38, %v2813_v17 }
 0x2a1   : > { %2175 = vrcp.f32 %v1356_v43  ;;  %v1435_v43 = vld [vmem:[%s2260_s20 + $0x68] sm:$0xff] (!%p1849_p5) }
 0x2a2   : > { %1480 = vst.msk [vmem:[%s2260_s20 + $0x58] sm:$0xff] (!%p1849_p5), %vm170_vm0, %v1456_v41 }
 0x2a9   : > { %v1362_v45 = vpop.xlane.xlu1 %1361 }
 0x2aa   : > { %v2174_v46 = vpop.eup %2173  ;;  %2177 = vrcp.f32 %v1362_v45  ;;  %v1458_v45 = vadd.f32 (!%p1849_p5), %v1435_v43, %v2817_v0 }
 0x2ab   : > { %v2176_v49 = vpop.eup %2175 }
 0x2ac   : > { %1482 = vst.msk [vmem:[%s2260_s20 + $0x68] sm:$0xff] (!%p1849_p5), %vm170_vm0, %v1458_v45 }
 0x2ae   : > { %v1365_v42 = vpop.xlane.xlu0 %1364 }
 0x2af   : > { %2179 = vrcp.f32 %v1365_v42  ;;  %v1434_v42 = vld [vmem:[%s2260_s20 + $0x60] sm:$0xff] (!%p1849_p5) }
 0x2b2   : > { %v1261_v44 = vpop.xlane.xlu0 %1260 }
 0x2b3   : > { %v2825_v2 = vadd.f32 %v2172_v11, %v1261_v44  ;;  %v1436_v11 = vld [vmem:[%s2260_s20 + $0x70] sm:$0xff] (!%p1849_p5)  ;;  %v1457_v44 = vadd.f32 (!%p1849_p5), %v1434_v42, %v2815_v23 }
 0x2b4   : > { %v2178_v53 = vpop.eup %2177 }
 0x2b5   : > { %1481 = vst.msk [vmem:[%s2260_s20 + $0x60] sm:$0xff] (!%p1849_p5), %vm170_vm0, %v1457_v44 }
 0x2b6   : > { %v1267_v47 = vpop.xlane.xlu0 %1266 }
 0x2b7   : > { %v2827_v48 = vadd.f32 %v2174_v46, %v1267_v47  ;;  %v1459_v46 = vadd.f32 (!%p1849_p5), %v1436_v11, %v2819_v34  ;;  %v1437_v47 = vld [vmem:[%s2260_s20 + $0x78] sm:$0xff] (!%p1849_p5) }
 0x2b8   : > { %v1368_v28 = vpop.xlane.xlu1 %1367 }
 0x2b9   : > { %2181 = vrcp.f32 %v1368_v28  ;;  %v2180_v56 = vpop.eup %2179  ;;  %v1438_v28 = vld [vmem:[%s2260_s20 + $0x80] sm:$0xff] (!%p1849_p5)  ;;  %1483 = vst.msk [vmem:[%s2260_s20 + $0x70] sm:$0xff] (!%p1849_p5), %vm170_vm0, %v1459_v46 }
 0x2bc   : > { %v1264_v50 = vpop.xlane.xlu1 %1263 }
 0x2bd   : > { %v2829_v51 = vadd.f32 %v2176_v49, %v1264_v50  ;;  %v1439_v49 = vld [vmem:[%s2260_s20 + $0x88] sm:$0xff] (!%p1849_p5)  ;;  %v1460_v50 = vadd.f32 (!%p1849_p5), %v1437_v47, %v2821_v26 }
 0x2bf   : > { %1484 = vst.msk [vmem:[%s2260_s20 + $0x78] sm:$0xff] (!%p1849_p5), %vm170_vm0, %v1460_v50 }
 0x2c0   : > { %v1270_v54 = vpop.xlane.xlu1 %1269  ;;  %1421 = sbr.rel (%p1849_p5) target bundleno = 715 (0x2cb), region = 36 }
 0x2c1   : > { %v2831_v57 = vadd.f32 %v2178_v53, %v1270_v54  ;;  %v1273_v58 = vpop.xlane.xlu0 %1272  ;;  %v1461_v53 = vadd.f32 (!%p1849_p5), %v1438_v28, %v2823_v40  ;;  %v1462_v54 = vadd.f32 (!%p1849_p5), %v1439_v49, %v2825_v2 }
 0x2c2   : > { %v2833_v60 = vadd.f32 %v2180_v56, %v1273_v58  ;;  %v1440_v56 = vld [vmem:[%s2260_s20 + $0x90] sm:$0xff] (!%p1849_p5)  ;;  %v1441_v58 = vld [vmem:[%s2260_s20 + $0x98] sm:$0xff] (!%p1849_p5) }
 0x2c3   : > { %v2182_v61 = vpop.eup %2181  ;;  %v1464_v5 = vadd.f32 (!%p1849_p5), %v1441_v58, %v2827_v48  ;;  %1485 = vst.msk [vmem:[%s2260_s20 + $0x80] sm:$0xff] (!%p1849_p5), %vm170_vm0, %v1461_v53  ;;  %1486 = vst.msk [vmem:[%s2260_s20 + $0x88] sm:$0xff] (!%p1849_p5), %vm170_vm0, %v1462_v54 }
 0x2c4   : > { %v1466_v10 = vadd.f32 (!%p1849_p5), %v1443_v8, %v2833_v60 }
 0x2c5   : > { %v1276_v62 = vpop.xlane.xlu1 %1275  ;;  %1488 = vst.msk [vmem:[%s2260_s20 + $0x98] sm:$0xff] (!%p1849_p5), %vm170_vm0, %v1464_v5 }
 0x2c6   : > { %v2835_v3 = vadd.f32 %v2182_v61, %v1276_v62  ;;  %v1442_v61 = vld [vmem:[%s2260_s20 + $0xa0] sm:$0xff] (!%p1849_p5)  ;;  %v1463_v62 = vadd.f32 (!%p1849_p5), %v1440_v56, %v2829_v51  ;;  %1490 = vst.msk [vmem:[%s2260_s20 + $0xa8] sm:$0xff] (!%p1849_p5), %vm170_vm0, %v1466_v10 }
 0x2c7   : > { %v1465_v6 = vadd.f32 %v1442_v61, %v2831_v57 }
 0x2c8   : > { %v1467_v14 = vadd.f32 %v1444_v9, %v2835_v3  ;;  %1487 = vst.msk [vmem:[%s2260_s20 + $0x90] sm:$0xff] %vm170_vm0, %v1463_v62 }
 0x2c9   : > { %1489 = vst.msk [vmem:[%s2260_s20 + $0xa0] sm:$0xff] %vm170_vm0, %v1465_v6 }
 0x2ca   : > { %1491 = vst.msk [vmem:[%s2260_s20 + $0xb0] sm:$0xff] %vm170_vm0, %v1467_v14 }
 0x2cb PF: > { %p1850_p6 = scmp.le.s32.totalorder %s2805_s26, 360 }
 0x2cc   : > { %v2932_v15 = vshrl.u32 (!%p1850_p6), %v219_v30, 7  ;;  %v2936_v16 = vstv (!%p1850_p6), %s1416_s25  ;;  %v1544_v29 = vld [vmem:[%s2260_s20] sm:$0xff] (!%p1850_p6)  ;;  %v1545_v38 = vld [vmem:[%s2260_s20 + $0x8] sm:$0xff] (!%p1850_p6)  ;;  %v1546_v33 = vld [vmem:[%s2260_s20 + $0x10] sm:$0xff] (!%p1850_p6) }
 0x2cd   : > { %1495 = sbr.rel (%p1850_p6) target bundleno = 751 (0x2ef), region = 40  ;;  %v1547_v1 = vld [vmem:[%s2260_s20 + $0x18] sm:$0xff] (!%p1850_p6)  ;;  %v1548_v44 = vld [vmem:[%s2260_s20 + $0x20] sm:$0xff] (!%p1850_p6)  ;;  %v1549_v53 = vld [vmem:[%s2260_s20 + $0x28] sm:$0xff] (!%p1850_p6) }
 0x2ce   : > { %v1521_v18 = vadd.s32 (!%p1850_p6), %v2936_v16, %v2932_v15  ;;  %v1498_v19 = vadd.s32 (!%p1850_p6), 8, %v2932_v15  ;;  %v1499_v21 = vadd.s32 (!%p1850_p6), 16, %v2932_v15  ;;  %v1500_v25 = vadd.s32 (!%p1850_p6), 24, %v2932_v15  ;;  %v1550_v54 = vld [vmem:[%s2260_s20 + $0x30] sm:$0xff] (!%p1850_p6)  ;;  %v1552_v14 = vld [vmem:[%s2260_s20 + $0x40] sm:$0xff] (!%p1850_p6) }
 0x2cf   : > { %v1501_v20 = vadd.s32 (!%p1850_p6), 32, %v2932_v15  ;;  %v1502_v30 = vadd.s32 (!%p1850_p6), 40, %v2932_v15  ;;  %v1503_v31 = vadd.s32 (!%p1850_p6), 48, %v2932_v15  ;;  %v1504_v27 = vadd.s32 (!%p1850_p6), 56, %v2932_v15 }
 0x2d0   : > { %vm1567_vm4 = vcmp.lt.s32.totalorder (!%p1850_p6), %v1521_v18, 360  ;;  %v1522_v32 = vadd.s32 (!%p1850_p6), %v2936_v16, %v1498_v19  ;;  %v1523_v22 = vadd.s32 (!%p1850_p6), %v2936_v16, %v1499_v21  ;;  %v1524_v35 = vadd.s32 (!%p1850_p6), %v2936_v16, %v1500_v25  ;;  %v1553_v18 = vld [vmem:[%s2260_s20 + $0x48] sm:$0xff] (!%p1850_p6)  ;;  %v1554_v25 = vld [vmem:[%s2260_s20 + $0x50] sm:$0xff] (!%p1850_p6) }
 0x2d1   : > { %v1590_v36 = vsel (!%p1850_p6), %vm1567_vm4, %v2777_v4, 0.0  ;;  %v1525_v41 = vadd.s32 (!%p1850_p6), %v2936_v16, %v1501_v20  ;;  %v1526_v42 = vadd.s32 (!%p1850_p6), %v2936_v16, %v1502_v30  ;;  %v1527_v43 = vadd.s32 (!%p1850_p6), %v2936_v16, %v1503_v31 }
 0x2d2   : > { %v1613_v11 = vadd.f32 (!%p1850_p6), %v1590_v36, %v1544_v29  ;;  %vm1568_vm8 = vcmp.lt.s32.totalorder (!%p1850_p6), %v1522_v32, 360  ;;  %vm1569_vm11 = vcmp.lt.s32.totalorder (!%p1850_p6), %v1523_v22, 360  ;;  %vm1570_vm12 = vcmp.lt.s32.totalorder (!%p1850_p6), %v1524_v35, 360 }
 0x2d3   : > { %v1591_v4 = vsel (!%p1850_p6), %vm1568_vm8, %v2783_v24, 0.0  ;;  %v1592_v45 = vsel (!%p1850_p6), %vm1569_vm11, %v2780_v12, 0.0  ;;  %v1593_v46 = vsel (!%p1850_p6), %vm1570_vm12, %v2788_v37, 0.0  ;;  %vm1571_vm13 = vcmp.lt.s32.totalorder (!%p1850_p6), %v1525_v41, 360 }
 0x2d4   : > { %1637 = vst.msk [vmem:[%s2260_s20] sm:$0xff] %vm170_vm0, %v1613_v11  ;;  %v1614_v47 = vadd.f32 %v1591_v4, %v1545_v38  ;;  %v1615_v28 = vadd.f32 %v1592_v45, %v1546_v33  ;;  %v1616_v49 = vadd.f32 %v1593_v46, %v1547_v1  ;;  %v1594_v50 = vsel %vm1571_vm13, %v2790_v39, 0.0  ;;  %v1551_v39 = vld [vmem:[%s2260_s20 + $0x38] sm:$0xff]  ;;  %v1556_v38 = vld [vmem:[%s2260_s20 + $0x60] sm:$0xff]  ;;  %v1558_v11 = vld [vmem:[%s2260_s20 + $0x70] sm:$0xff] }
 0x2d5   : > { %v1617_v56 = vadd.f32 %v1594_v50, %v1548_v44  ;;  %vm1572_vm14 = vcmp.lt.s32.totalorder %v1526_v42, 360  ;;  %vm1573_vm15 = vcmp.lt.s32.totalorder %v1527_v43, 360  ;;  %v1528_v12 = vadd.s32 %v2936_v16, %v1504_v27  ;;  %v1555_v27 = vld [vmem:[%s2260_s20 + $0x58] sm:$0xff]  ;;  %v1557_v42 = vld [vmem:[%s2260_s20 + $0x68] sm:$0xff] }
 0x2d6   : > { %1638 = vst.msk [vmem:[%s2260_s20 + $0x8] sm:$0xff] %vm170_vm0, %v1614_v47  ;;  %1639 = vst.msk [vmem:[%s2260_s20 + $0x10] sm:$0xff] %vm170_vm0, %v1615_v28  ;;  %v1595_v24 = vsel %vm1572_vm14, %v2796_v52, 0.0  ;;  %v1596_v37 = vsel %vm1573_vm15, %v2798_v55, 0.0  ;;  %v1505_v58 = vadd.s32 64, %v2932_v15  ;;  %v1506_v61 = vadd.s32 72, %v2932_v15 }
 0x2d7   : > { %1640 = vst.msk [vmem:[%s2260_s20 + $0x18] sm:$0xff] %vm170_vm0, %v1616_v49  ;;  %1641 = vst.msk [vmem:[%s2260_s20 + $0x20] sm:$0xff] %vm170_vm0, %v1617_v56  ;;  %v1618_v62 = vadd.f32 %v1595_v24, %v1549_v53  ;;  %v1619_v5 = vadd.f32 %v1596_v37, %v1550_v54  ;;  %vm1574_vm1 = vcmp.lt.s32.totalorder %v1528_v12, 360  ;;  %v1507_v6 = vadd.s32 80, %v2932_v15  ;;  %v1559_v49 = vld [vmem:[%s2260_s20 + $0x78] sm:$0xff]  ;;  %v1561_v56 = vld [vmem:[%s2260_s20 + $0x88] sm:$0xff] }
 0x2d8   : > { %v1597_v8 = vsel %vm1574_vm1, %v2801_v59, 0.0  ;;  %v1529_v52 = vadd.s32 %v2936_v16, %v1505_v58  ;;  %v1530_v55 = vadd.s32 %v2936_v16, %v1506_v61  ;;  %v1508_v9 = vadd.s32 88, %v2932_v15 }
 0x2d9   : > { %1642 = vst.msk [vmem:[%s2260_s20 + $0x28] sm:$0xff] %vm170_vm0, %v1618_v62  ;;  %1643 = vst.msk [vmem:[%s2260_s20 + $0x30] sm:$0xff] %vm170_vm0, %v1619_v5  ;;  %v1620_v10 = vadd.f32 %v1597_v8, %v1551_v39  ;;  %v1531_v19 = vadd.s32 %v2936_v16, %v1507_v6  ;;  %v1509_v21 = vadd.s32 96, %v2932_v15  ;;  %v1510_v59 = vadd.s32 104, %v2932_v15 }
 0x2da   : > { %vm1575_vm2 = vcmp.lt.s32.totalorder %v1529_v52, 360  ;;  %vm1576_vm3 = vcmp.lt.s32.totalorder %v1530_v55, 360  ;;  %v1532_v29 = vadd.s32 %v2936_v16, %v1508_v9  ;;  %v1511_v20 = vadd.s32 112, %v2932_v15  ;;  %v1563_v55 = vld [vmem:[%s2260_s20 + $0x98] sm:$0xff] }
 0x2db   : > { %1644 = vst.msk [vmem:[%s2260_s20 + $0x38] sm:$0xff] %vm170_vm0, %v1620_v10  ;;  %v1598_v30 = vsel %vm1575_vm2, %v2807_v63, 0.0  ;;  %v1599_v31 = vsel %vm1576_vm3, %v2809_v7, 0.0  ;;  %vm1577_vm5 = vcmp.lt.s32.totalorder %v1531_v19, 360  ;;  %v1533_v32 = vadd.s32 %v2936_v16, %v1509_v21  ;;  %v1565_v21 = vld [vmem:[%s2260_s20 + $0xa8] sm:$0xff] }
 0x2dc   : > { %v1621_v22 = vadd.f32 %v1598_v30, %v1552_v14  ;;  %v1622_v35 = vadd.f32 %v1599_v31, %v1553_v18  ;;  %v1600_v36 = vsel %vm1577_vm5, %v2811_v13, 0.0  ;;  %vm1578_vm6 = vcmp.lt.s32.totalorder %v1532_v29, 360 }
 0x2dd   : > { %v1623_v33 = vadd.f32 %v1600_v36, %v1554_v25  ;;  %v1601_v1 = vsel %vm1578_vm6, %v2813_v17, 0.0  ;;  %vm1579_vm7 = vcmp.lt.s32.totalorder %v1533_v32, 360  ;;  %v1534_v63 = vadd.s32 %v2936_v16, %v1510_v59  ;;  %v1566_v59 = vld [vmem:[%s2260_s20 + $0xb0] sm:$0xff] }
 0x2de   : > { %1645 = vst.msk [vmem:[%s2260_s20 + $0x40] sm:$0xff] %vm170_vm0, %v1621_v22  ;;  %1646 = vst.msk [vmem:[%s2260_s20 + $0x48] sm:$0xff] %vm170_vm0, %v1622_v35  ;;  %v1624_v7 = vadd.f32 %v1601_v1, %v1555_v27  ;;  %v1602_v41 = vsel %vm1579_vm7, %v2815_v23, 0.0  ;;  %v1535_v13 = vadd.s32 %v2936_v16, %v1511_v20  ;;  %v1512_v43 = vadd.s32 120, %v2932_v15 }
 0x2df   : > { %1647 = vst.msk [vmem:[%s2260_s20 + $0x50] sm:$0xff] %vm170_vm0, %v1623_v33  ;;  %v1625_v17 = vadd.f32 %v1602_v41, %v1556_v38  ;;  %vm1580_vm9 = vcmp.lt.s32.totalorder %v1534_v63, 360  ;;  %v1513_v44 = vadd.s32 128, %v2932_v15  ;;  %v1514_v4 = vadd.s32 136, %v2932_v15 }
 0x2e0   : > { %1648 = vst.msk [vmem:[%s2260_s20 + $0x58] sm:$0xff] %vm170_vm0, %v1624_v7  ;;  %v1603_v23 = vsel %vm1580_vm9, %v2817_v0, 0.0  ;;  %vm1581_vm10 = vcmp.lt.s32.totalorder %v1535_v13, 360  ;;  %v1536_v45 = vadd.s32 %v2936_v16, %v1512_v43  ;;  %v1515_v46 = vadd.s32 144, %v2932_v15  ;;  %v1560_v0 = vld [vmem:[%s2260_s20 + $0x80] sm:$0xff] }
 0x2e1   : > { %1649 = vst.msk [vmem:[%s2260_s20 + $0x60] sm:$0xff] %vm170_vm0, %v1625_v17  ;;  %v1626_v47 = vadd.f32 %v1603_v23, %v1557_v42  ;;  %v1604_v28 = vsel %vm1581_vm10, %v2819_v34, 0.0  ;;  %v1537_v50 = vadd.s32 %v2936_v16, %v1513_v44  ;;  %v1538_v53 = vadd.s32 %v2936_v16, %v1514_v4  ;;  %v1562_v34 = vld [vmem:[%s2260_s20 + $0x90] sm:$0xff] }
 0x2e2   : > { %v1627_v54 = vadd.f32 %v1604_v28, %v1558_v11  ;;  %vm1582_vm4 = vcmp.lt.s32.totalorder %v1536_v45, 360  ;;  %v1539_v12 = vadd.s32 %v2936_v16, %v1515_v46  ;;  %v1516_v24 = vadd.s32 152, %v2932_v15 }
 0x2e3   : > { %1650 = vst.msk [vmem:[%s2260_s20 + $0x68] sm:$0xff] %vm170_vm0, %v1626_v47  ;;  %v1605_v37 = vsel %vm1582_vm4, %v2821_v26, 0.0  ;;  %vm1583_vm8 = vcmp.lt.s32.totalorder %v1537_v50, 360  ;;  %vm1584_vm11 = vcmp.lt.s32.totalorder %v1538_v53, 360  ;;  %v1517_v39 = vadd.s32 160, %v2932_v15 }
 0x2e4   : > { %1651 = vst.msk [vmem:[%s2260_s20 + $0x70] sm:$0xff] %vm170_vm0, %v1627_v54  ;;  %v1628_v58 = vadd.f32 %v1605_v37, %v1559_v49  ;;  %v1606_v61 = vsel %vm1583_vm8, %v2823_v40, 0.0  ;;  %v1607_v62 = vsel %vm1584_vm11, %v2825_v2, 0.0  ;;  %vm1585_vm12 = vcmp.lt.s32.totalorder %v1539_v12, 360 }
 0x2e5   : > { %v1629_v5 = vadd.f32 %v1606_v61, %v1560_v0  ;;  %v1630_v26 = vadd.f32 %v1607_v62, %v1561_v56  ;;  %v1608_v6 = vsel %vm1585_vm12, %v2829_v51, 0.0  ;;  %v1540_v8 = vadd.s32 %v2936_v16, %v1516_v24  ;;  %v1564_v51 = vld [vmem:[%s2260_s20 + $0xa0] sm:$0xff] }
 0x2e6   : > { %1652 = vst.msk [vmem:[%s2260_s20 + $0x78] sm:$0xff] %vm170_vm0, %v1628_v58  ;;  %v1631_v52 = vadd.f32 %v1608_v6, %v1562_v34  ;;  %v1541_v9 = vadd.s32 %v2936_v16, %v1517_v39  ;;  %v1518_v40 = vadd.s32 168, %v2932_v15  ;;  %v1519_v2 = vadd.s32 176, %v2932_v15 }
 0x2e7   : > { %1653 = vst.msk [vmem:[%s2260_s20 + $0x80] sm:$0xff] %vm170_vm0, %v1629_v5  ;;  %1654 = vst.msk [vmem:[%s2260_s20 + $0x88] sm:$0xff] %vm170_vm0, %v1630_v26  ;;  %vm1586_vm13 = vcmp.lt.s32.totalorder %v1540_v8, 360 }
 0x2e8   : > { %1655 = vst.msk [vmem:[%s2260_s20 + $0x90] sm:$0xff] %vm170_vm0, %v1631_v52  ;;  %v1609_v10 = vsel %vm1586_vm13, %v2827_v48, 0.0  ;;  %vm1587_vm14 = vcmp.lt.s32.totalorder %v1541_v9, 360  ;;  %v1542_v14 = vadd.s32 %v2936_v16, %v1518_v40  ;;  %v1543_v18 = vadd.s32 %v2936_v16, %v1519_v2 }
 0x2e9   : > { %v1632_v15 = vadd.f32 %v1609_v10, %v1563_v55  ;;  %v1610_v19 = vsel %vm1587_vm14, %v2831_v57, 0.0 }
 0x2ea   : > { %v1633_v25 = vadd.f32 %v1610_v19, %v1564_v51  ;;  %vm1588_vm15 = vcmp.lt.s32.totalorder %v1542_v14, 360  ;;  %vm1589_vm1 = vcmp.lt.s32.totalorder %v1543_v18, 360 }
 0x2eb   : > { %1656 = vst.msk [vmem:[%s2260_s20 + $0x98] sm:$0xff] %vm170_vm0, %v1632_v15  ;;  %v1611_v29 = vsel %vm1588_vm15, %v2833_v60, 0.0  ;;  %v1612_v48 = vsel %vm1589_vm1, %v2835_v3, 0.0 }
 0x2ec   : > { %1657 = vst.msk [vmem:[%s2260_s20 + $0xa0] sm:$0xff] %vm170_vm0, %v1633_v25  ;;  %v1634_v20 = vadd.f32 %v1611_v29, %v1565_v21  ;;  %v1635_v30 = vadd.f32 %v1612_v48, %v1566_v59 }
 0x2ee   : > { %1658 = vst.msk [vmem:[%s2260_s20 + $0xa8] sm:$0xff] %vm170_vm0, %v1634_v20  ;;  %1659 = vst.msk [vmem:[%s2260_s20 + $0xb0] sm:$0xff] %vm170_vm0, %v1635_v30 }
 0x2ef PF: > { %s12_s11 = sadd.s32 1, %s2205_s11   ;;  %s3088_s9 = smov %s2201_s10 }
 0x2f0   : > { %p9_p7 = scmp.ge.s32.totalorder %s12_s11, 4   ;;  %s3089_s10 = smov %s3091_s12 }
 0x2f2   :  { %11 = sbr.rel (!%p9_p7) target bundleno = 2 (0x2), region = 70 }

</bundles_post_ra>
